<compile_context>
chip_gen: v6e
topology: v6e:2x2x1
jax: 0.10.0
libtpu: 0.0.40
codegen_flags: <defaults>
</compile_context>

<pallas_src>
import functools

import jax
import jax.numpy as jnp
from jax.experimental import pallas as pl
from jax.experimental.pallas import tpu as pltpu

_LANE = 128


def _round_up(v, m):
    return ((v + m - 1) // m) * m


def _classifier_kernel(out_valid, n_hidden_layers,
                       x_ref, w1_ref, b1_ref, wh_ref, bh_ref,
                       w2_ref, b2_ref, w3_ref, b3_ref,
                       out_ref):
    # fc1 -> relu  (dropout = identity in eval; BN1 is folded into hidden layer 0)
    h = jnp.dot(x_ref[...], w1_ref[...], preferred_element_type=jnp.float32)
    h = jnp.maximum(h + b1_ref[...], 0.0)

    # Hidden layers, statically unrolled (small static L; weights already carry
    # the previous BatchNorm folded in).
    for i in range(n_hidden_layers):
        hi = jnp.dot(h.astype(jnp.bfloat16), wh_ref[i],
                     preferred_element_type=jnp.float32)
        h = jnp.maximum(hi + bh_ref[i], 0.0)

    # fc2 -> relu  (BN_{L-1} folded into fc2; BN2 folded into fc3)
    h2 = jnp.dot(h.astype(jnp.bfloat16), w2_ref[...],
                 preferred_element_type=jnp.float32)
    h2 = jnp.maximum(h2 + b2_ref[...], 0.0)

    logits = jnp.dot(h2.astype(jnp.bfloat16), w3_ref[...],
                     preferred_element_type=jnp.float32) + b3_ref[...]

    # Mask padded output lanes so they contribute 0 to the softmax (f32 only —
    # -1e30 would overflow in bf16).
    lane = jax.lax.broadcasted_iota(jnp.int32, logits.shape, 1)
    logits = jnp.where(lane < out_valid, logits, jnp.float32(-1e30))

    m = jnp.max(logits, axis=1, keepdims=True)
    e = jnp.exp(logits - m)
    denom = jnp.sum(e, axis=1, keepdims=True)
    out_ref[...] = (e / denom).astype(out_ref.dtype)


def fold_batchnorm(params, n_hidden_layers):
    """Fold each eval-mode BN (scale s, shift t) into the *following* Linear.

    relu_out * s + t, then @W + b   ==   relu_out @ (diag(s) W) + (t @ W + b)
    The fold is exact in f32 and done before padding, so zero padding of the
    folded weights/biases keeps padded lanes exactly zero.
    """
    (w1, b1, s1, t1, wh, bh, sh, th, w2, b2, s2, t2, w3, b3) = params

    wh_f, bh_f = [], []
    prev_s, prev_t = s1, t1
    for i in range(n_hidden_layers):
        w = wh[i]
        wh_f.append(w * prev_s.reshape(-1, 1))
        bh_f.append(prev_t @ w + bh[i])
        prev_s, prev_t = sh[i], th[i]

    w2_f = w2 * prev_s.reshape(-1, 1)
    b2_f = prev_t @ w2 + b2
    w3_f = w3 * s2.reshape(-1, 1)
    b3_f = t2 @ w3 + b3

    return (w1, b1, jnp.stack(wh_f), jnp.stack(bh_f), w2_f, b2_f, w3_f, b3_f)


def classifier_net_forward(x, params, n_hidden_layers, *, tile_n=128):
    """Full ClassifierNet forward pass in a single Pallas kernel.

    tile_n guidance: keep >= 2 batch tiles on v7x (2 TensorCores share the
    'parallel' batch axis); on single-TC v5e/v6e a tile covering the whole
    padded batch (e.g. 256) minimizes per-grid-step overhead.
    """
    assert n_hidden_layers >= 1, "kernel requires at least one hidden layer"

    w1, b1, wh, bh, w2, b2, w3, b3 = fold_batchnorm(params, n_hidden_layers)

    n, in_size = x.shape
    hid = w1.shape[1]
    bsz = w2.shape[1]
    out_size = w3.shape[1]

    in_p = _round_up(in_size, _LANE)
    hid_p = _round_up(hid, _LANE)
    bsz_p = _round_up(bsz, _LANE)
    out_p = _round_up(out_size, _LANE)
    n_p = _round_up(n, tile_n)

    f32, bf16 = jnp.float32, jnp.bfloat16

    def pad2(a, r, c, dtype=f32):
        a = a.astype(f32)
        return jnp.pad(a, ((0, r - a.shape[0]), (0, c - a.shape[1]))).astype(dtype)

    def pad3(a, r, c, dtype=f32):
        a = a.astype(f32)
        return jnp.pad(a, ((0, 0), (0, r - a.shape[1]), (0, c - a.shape[2]))).astype(dtype)

    # Zero padding keeps padded features exactly 0 through Linear/ReLU, so the
    # padded lanes never affect the valid outputs.
    x_p = pad2(x, n_p, in_p, bf16)            # activations in bf16 (halves HBM traffic)

    w1_p = pad2(w1, in_p, hid_p, bf16)
    b1_p = pad2(b1, 1, hid_p)
    wh_p = pad3(wh, hid_p, hid_p, bf16)        # (L, H, H) — whole stack resident in VMEM
    bh_p = pad3(bh, 1, hid_p)                  # (L, 1, H)
    w2_p = pad2(w2, hid_p, bsz_p, bf16)
    b2_p = pad2(b2, 1, bsz_p)
    w3_p = pad2(w3, bsz_p, out_p, bf16)
    b3_p = pad2(b3, 1, out_p)

    grid = (n_p // tile_n,)

    def const(a):
        ndim = a.ndim
        return pl.BlockSpec(a.shape, lambda b, _nd=ndim: (0,) * _nd)

    in_specs = [
        pl.BlockSpec((tile_n, in_p), lambda b: (b, 0)),   # x batch tile
        const(w1_p), const(b1_p),
        const(wh_p), const(bh_p),
        const(w2_p), const(b2_p),
        const(w3_p), const(b3_p),
    ]
    out_spec = pl.BlockSpec((tile_n, out_p), lambda b: (b, 0))

    flops = 2 * n_p * (in_p * hid_p + n_hidden_layers * hid_p * hid_p
                       + hid_p * bsz_p + bsz_p * out_p)
    bytes_accessed = int(
        x_p.size * x_p.dtype.itemsize + n_p * out_p * 4
        + sum(int(a.size) * a.dtype.itemsize for a in
              (w1_p, b1_p, wh_p, bh_p, w2_p, b2_p, w3_p, b3_p)))
    cost = pl.CostEstimate(flops=int(flops),
                           transcendentals=int(n_p * out_p),
                           bytes_accessed=bytes_accessed)

    kernel = functools.partial(_classifier_kernel, out_size, n_hidden_layers)

    out_padded = pl.pallas_call(
        kernel,
        out_shape=jax.ShapeDtypeStruct((n_p, out_p), jnp.float32),
        grid=grid,
        in_specs=in_specs,
        out_specs=out_spec,
        compiler_params=pltpu.CompilerParams(
            dimension_semantics=("parallel",),
            # <= 48 MiB so the same plan also fits v7x's 64 MiB physical VMEM.
            vmem_limit_bytes=48 * 1024 * 1024),
        cost_estimate=cost,
    )(x_p, w1_p, b1_p, wh_p, bh_p, w2_p, b2_p, w3_p, b3_p)

    return out_padded[:n, :out_size]


def make_params(key, input_size, hidden_size, hidden_layers, output_size,
                batch_size, eps=1e-5):
    """Deterministic synthetic parameters (PyTorch-shaped, BN folded to scale/shift)."""
    keys = jax.random.split(key, 64)
    k = iter(keys)

    def linear(kw, kb, fan_in, fan_out):
        # PyTorch Linear weight is (out, in); we store transposed (in, out).
        w = jax.random.normal(kw, (fan_in, fan_out), jnp.float32) * 0.1
        b = jax.random.normal(kb, (1, fan_out), jnp.float32) * 0.05
        return w, b

    def bn(kg, kb, km, kv, feat):
        gamma = 1.0 + 0.1 * jax.random.normal(kg, (1, feat), jnp.float32)
        beta = 0.05 * jax.random.normal(kb, (1, feat), jnp.float32)
        mean = 0.1 * jax.random.normal(km, (1, feat), jnp.float32)
        var = 0.5 + jax.random.uniform(kv, (1, feat), jnp.float32)
        scale = gamma / jnp.sqrt(var + eps)
        shift = beta - mean * scale
        return scale, shift

    w1, b1 = linear(next(k), next(k), input_size, hidden_size)
    s1, t1 = bn(next(k), next(k), next(k), next(k), hidden_size)

    wh_list, bh_list, sh_list, th_list = [], [], [], []
    for _ in range(hidden_layers):
        w, b = linear(next(k), next(k), hidden_size, hidden_size)
        s, t = bn(next(k), next(k), next(k), next(k), hidden_size)
        wh_list.append(w); bh_list.append(b); sh_list.append(s); th_list.append(t)
    wh = jnp.stack(wh_list)           # (L, H, H)
    bh = jnp.stack(bh_list)           # (L, 1, H)
    sh = jnp.stack(sh_list)           # (L, 1, H)
    th = jnp.stack(th_list)           # (L, 1, H)

    w2, b2 = linear(next(k), next(k), hidden_size, batch_size)
    s2, t2 = bn(next(k), next(k), next(k), next(k), batch_size)

    w3, b3 = linear(next(k), next(k), batch_size, output_size)

    return (w1, b1, s1, t1, wh, bh, sh, th, w2, b2, s2, t2, w3, b3)


def reference_forward(x, params, n_hidden_layers):
    """Plain-JAX f32 reference with the original (unfolded) module ordering."""
    (w1, b1, s1, t1, wh, bh, sh, th, w2, b2, s2, t2, w3, b3) = params
    h = jnp.maximum(x @ w1 + b1, 0.0) * s1 + t1
    for i in range(n_hidden_layers):
        h = jnp.maximum(h @ wh[i] + bh[i], 0.0) * sh[i] + th[i]
    h = jnp.maximum(h @ w2 + b2, 0.0) * s2 + t2
    logits = h @ w3 + b3
    return jax.nn.softmax(logits, axis=1)


if __name__ == "__main__":
    # Small shapes consistent with the module's forward:
    #   N (rows) = 200, input_size = 32, hidden_size = 64,
    #   hidden_layers = 2, batch_size (fc2 out-features) = 8, output_size = 4.
    N = 200
    INPUT_SIZE = 32
    HIDDEN_SIZE = 64
    HIDDEN_LAYERS = 2
    BATCH_SIZE = 8
    OUTPUT_SIZE = 4

    key = jax.random.PRNGKey(0)
    kx, kp = jax.random.split(key)
    x = jax.random.normal(kx, (N, INPUT_SIZE), jnp.float32)
    params = make_params(kp, INPUT_SIZE, HIDDEN_SIZE, HIDDEN_LAYERS,
                         OUTPUT_SIZE, BATCH_SIZE)

    # tile_n=128 -> 2 batch tiles (keeps both v7x TensorCores busy; use 256 on
    # single-TC v5e/v6e to do the whole batch in one grid step).
    out = classifier_net_forward(x, params, HIDDEN_LAYERS, tile_n=128)
    out = jax.block_until_ready(out)

    ref = reference_forward(x, params, HIDDEN_LAYERS)
    assert out.shape == (N, OUTPUT_SIZE)
    # bf16 matmul operands (f32 accumulation) vs pure-f32 reference -> relaxed tol.
    assert jnp.allclose(out, ref, atol=2e-2, rtol=2e-2), "mismatch vs JAX reference"
    assert jnp.allclose(jnp.sum(out, axis=1), 1.0, atol=1e-3), "softmax rows must sum to ~1"

    print("KERNEL_OK")
</pallas_src>

<mosaic_0001>
module attributes {stable_mosaic.version = 11 : i64} {
  func.func @_classifier_kernel(%arg0: i32, %arg1: memref<128x128xbf16, #tpu.memory_space<vmem>>, %arg2: memref<128x128xbf16, #tpu.memory_space<vmem>>, %arg3: memref<1x128xf32, #tpu.memory_space<vmem>>, %arg4: memref<2x128x128xbf16, #tpu.memory_space<vmem>>, %arg5: memref<2x1x128xf32, #tpu.memory_space<vmem>>, %arg6: memref<128x128xbf16, #tpu.memory_space<vmem>>, %arg7: memref<1x128xf32, #tpu.memory_space<vmem>>, %arg8: memref<128x128xbf16, #tpu.memory_space<vmem>>, %arg9: memref<1x128xf32, #tpu.memory_space<vmem>>, %arg10: memref<128x128xf32, #tpu.memory_space<vmem>>) attributes {dimension_semantics = [#tpu.dimension_semantics<parallel>], iteration_bounds = array<i64: 2>, scalar_prefetch = 0 : i64, scratch_operands = 0 : i64, tpu.core_type = #tpu.core_type<tc>, window_params = [{transform_indices = @transform_0, window_bounds = array<i64: 128, 128>}, {pipeline_mode = #tpu.pipeline_mode<synchronous>, transform_indices = @transform_1, window_bounds = array<i64: 128, 128>}, {pipeline_mode = #tpu.pipeline_mode<synchronous>, transform_indices = @transform_2, window_bounds = array<i64: 1, 128>}, {pipeline_mode = #tpu.pipeline_mode<synchronous>, transform_indices = @transform_3, window_bounds = array<i64: 2, 128, 128>}, {pipeline_mode = #tpu.pipeline_mode<synchronous>, transform_indices = @transform_4, window_bounds = array<i64: 2, 1, 128>}, {pipeline_mode = #tpu.pipeline_mode<synchronous>, transform_indices = @transform_5, window_bounds = array<i64: 128, 128>}, {pipeline_mode = #tpu.pipeline_mode<synchronous>, transform_indices = @transform_6, window_bounds = array<i64: 1, 128>}, {pipeline_mode = #tpu.pipeline_mode<synchronous>, transform_indices = @transform_7, window_bounds = array<i64: 128, 128>}, {pipeline_mode = #tpu.pipeline_mode<synchronous>, transform_indices = @transform_8, window_bounds = array<i64: 1, 128>}, {transform_indices = @transform_9, window_bounds = array<i64: 128, 128>}]} {
    %c0 = arith.constant 0 : index
    %c0_0 = arith.constant 0 : index
    %0 = vector.load %arg1[%c0, %c0_0] : memref<128x128xbf16, #tpu.memory_space<vmem>>, vector<128x128xbf16>
    %c0_1 = arith.constant 0 : index
    %c0_2 = arith.constant 0 : index
    %1 = vector.load %arg2[%c0_1, %c0_2] : memref<128x128xbf16, #tpu.memory_space<vmem>>, vector<128x128xbf16>
    %cst = arith.constant dense<0.000000e+00> : vector<128x128xf32>
    %2 = tpu.matmul %0, %1, %cst {dimension_numbers = #tpu.dot_dimension_numbers<[1], [0], [0], [1], [0, 0, 1, 1], [], []>} : vector<128x128xbf16>, vector<128x128xbf16>, vector<128x128xf32> -> vector<128x128xf32>
    %c0_3 = arith.constant 0 : index
    %c0_4 = arith.constant 0 : index
    %3 = vector.load %arg3[%c0_3, %c0_4] : memref<1x128xf32, #tpu.memory_space<vmem>>, vector<1x128xf32>
    %4 = vector.broadcast %3 : vector<1x128xf32> to vector<128x128xf32>
    %5 = arith.addf %2, %4 : vector<128x128xf32>
    %cst_5 = arith.constant 0.000000e+00 : f32
    %6 = vector.broadcast %cst_5 : f32 to vector<128x128xf32>
    %7 = arith.maximumf %5, %6 : vector<128x128xf32>
    %8 = arith.truncf %7 : vector<128x128xf32> to vector<128x128xbf16>
    %c0_6 = arith.constant 0 : index
    %c0_7 = arith.constant 0 : index
    %c0_8 = arith.constant 0 : index
    %9 = vector.load %arg4[%c0_6, %c0_7, %c0_8] : memref<2x128x128xbf16, #tpu.memory_space<vmem>>, vector<1x128x128xbf16>
    %10 = vector.shape_cast %9 : vector<1x128x128xbf16> to vector<128x128xbf16>
    %cst_9 = arith.constant dense<0.000000e+00> : vector<128x128xf32>
    %11 = tpu.matmul %8, %10, %cst_9 {dimension_numbers = #tpu.dot_dimension_numbers<[1], [0], [0], [1], [0, 0, 1, 1], [], []>} : vector<128x128xbf16>, vector<128x128xbf16>, vector<128x128xf32> -> vector<128x128xf32>
    %c0_10 = arith.constant 0 : index
    %c0_11 = arith.constant 0 : index
    %c0_12 = arith.constant 0 : index
    %12 = vector.load %arg5[%c0_10, %c0_11, %c0_12] : memref<2x1x128xf32, #tpu.memory_space<vmem>>, vector<1x1x128xf32>
    %13 = vector.shape_cast %12 : vector<1x1x128xf32> to vector<1x128xf32>
    %14 = vector.broadcast %13 : vector<1x128xf32> to vector<128x128xf32>
    %15 = arith.addf %11, %14 : vector<128x128xf32>
    %cst_13 = arith.constant 0.000000e+00 : f32
    %16 = vector.broadcast %cst_13 : f32 to vector<128x128xf32>
    %17 = arith.maximumf %15, %16 : vector<128x128xf32>
    %18 = arith.truncf %17 : vector<128x128xf32> to vector<128x128xbf16>
    %c1 = arith.constant 1 : index
    %c0_14 = arith.constant 0 : index
    %c0_15 = arith.constant 0 : index
    %19 = vector.load %arg4[%c1, %c0_14, %c0_15] : memref<2x128x128xbf16, #tpu.memory_space<vmem>>, vector<1x128x128xbf16>
    %20 = vector.shape_cast %19 : vector<1x128x128xbf16> to vector<128x128xbf16>
    %cst_16 = arith.constant dense<0.000000e+00> : vector<128x128xf32>
    %21 = tpu.matmul %18, %20, %cst_16 {dimension_numbers = #tpu.dot_dimension_numbers<[1], [0], [0], [1], [0, 0, 1, 1], [], []>} : vector<128x128xbf16>, vector<128x128xbf16>, vector<128x128xf32> -> vector<128x128xf32>
    %c1_17 = arith.constant 1 : index
    %c0_18 = arith.constant 0 : index
    %c0_19 = arith.constant 0 : index
    %22 = vector.load %arg5[%c1_17, %c0_18, %c0_19] : memref<2x1x128xf32, #tpu.memory_space<vmem>>, vector<1x1x128xf32>
    %23 = vector.shape_cast %22 : vector<1x1x128xf32> to vector<1x128xf32>
    %24 = vector.broadcast %23 : vector<1x128xf32> to vector<128x128xf32>
    %25 = arith.addf %21, %24 : vector<128x128xf32>
    %cst_20 = arith.constant 0.000000e+00 : f32
    %26 = vector.broadcast %cst_20 : f32 to vector<128x128xf32>
    %27 = arith.maximumf %25, %26 : vector<128x128xf32>
    %28 = arith.truncf %27 : vector<128x128xf32> to vector<128x128xbf16>
    %c0_21 = arith.constant 0 : index
    %c0_22 = arith.constant 0 : index
    %29 = vector.load %arg6[%c0_21, %c0_22] : memref<128x128xbf16, #tpu.memory_space<vmem>>, vector<128x128xbf16>
    %cst_23 = arith.constant dense<0.000000e+00> : vector<128x128xf32>
    %30 = tpu.matmul %28, %29, %cst_23 {dimension_numbers = #tpu.dot_dimension_numbers<[1], [0], [0], [1], [0, 0, 1, 1], [], []>} : vector<128x128xbf16>, vector<128x128xbf16>, vector<128x128xf32> -> vector<128x128xf32>
    %c0_24 = arith.constant 0 : index
    %c0_25 = arith.constant 0 : index
    %31 = vector.load %arg7[%c0_24, %c0_25] : memref<1x128xf32, #tpu.memory_space<vmem>>, vector<1x128xf32>
    %32 = vector.broadcast %31 : vector<1x128xf32> to vector<128x128xf32>
    %33 = arith.addf %30, %32 : vector<128x128xf32>
    %cst_26 = arith.constant 0.000000e+00 : f32
    %34 = vector.broadcast %cst_26 : f32 to vector<128x128xf32>
    %35 = arith.maximumf %33, %34 : vector<128x128xf32>
    %36 = arith.truncf %35 : vector<128x128xf32> to vector<128x128xbf16>
    %c0_27 = arith.constant 0 : index
    %c0_28 = arith.constant 0 : index
    %37 = vector.load %arg8[%c0_27, %c0_28] : memref<128x128xbf16, #tpu.memory_space<vmem>>, vector<128x128xbf16>
    %cst_29 = arith.constant dense<0.000000e+00> : vector<128x128xf32>
    %38 = tpu.matmul %36, %37, %cst_29 {dimension_numbers = #tpu.dot_dimension_numbers<[1], [0], [0], [1], [0, 0, 1, 1], [], []>} : vector<128x128xbf16>, vector<128x128xbf16>, vector<128x128xf32> -> vector<128x128xf32>
    %c0_30 = arith.constant 0 : index
    %c0_31 = arith.constant 0 : index
    %39 = vector.load %arg9[%c0_30, %c0_31] : memref<1x128xf32, #tpu.memory_space<vmem>>, vector<1x128xf32>
    %40 = vector.broadcast %39 : vector<1x128xf32> to vector<128x128xf32>
    %41 = arith.addf %38, %40 : vector<128x128xf32>
    %42 = tpu.iota {dimensions = array<i32: 1>} : vector<128x128xi32>
    %c4_i32 = arith.constant 4 : i32
    %43 = vector.broadcast %c4_i32 : i32 to vector<128x128xi32>
    %44 = arith.cmpi slt, %42, %43 : vector<128x128xi32>
    %cst_32 = arith.constant -1.000000e+30 : f32
    %45 = vector.broadcast %cst_32 : f32 to vector<128x128xf32>
    %46 = arith.select %44, %41, %45 : vector<128x128xi1>, vector<128x128xf32>
    %cst_33 = arith.constant dense<0xFF800000> : vector<128xf32>
    %47 = vector.multi_reduction <maximumf>, %46, %cst_33 [1] : vector<128x128xf32> to vector<128xf32>
    %48 = vector.shape_cast %47 : vector<128xf32> to vector<128x1xf32>
    %49 = vector.broadcast %48 : vector<128x1xf32> to vector<128x128xf32>
    %50 = arith.subf %46, %49 : vector<128x128xf32>
    %51 = math.exp %50 : vector<128x128xf32>
    %cst_34 = arith.constant dense<0.000000e+00> : vector<128xf32>
    %52 = vector.multi_reduction <add>, %51, %cst_34 [1] : vector<128x128xf32> to vector<128xf32>
    %53 = vector.shape_cast %52 : vector<128xf32> to vector<128x1xf32>
    %54 = vector.broadcast %53 : vector<128x1xf32> to vector<128x128xf32>
    %55 = arith.divf %51, %54 : vector<128x128xf32>
    %c0_35 = arith.constant 0 : index
    %c0_36 = arith.constant 0 : index
    %56 = vector.load %arg10[%c0_35, %c0_36] : memref<128x128xf32, #tpu.memory_space<vmem>>, vector<128x128xf32>
    tpu.vector_store %arg10[%c0_35, %c0_36], %55 {strides = array<i32>} : memref<128x128xf32, #tpu.memory_space<vmem>>, vector<128x128xf32>,
    return
  }
  func.func @transform_0(%arg0: i32) -> (i32, i32) {
    %c0_i32 = arith.constant 0 : i32
    %c0_i32_0 = arith.constant 0 : i32
    return %arg0, %c0_i32 : i32, i32
  }
  func.func @transform_1(%arg0: i32) -> (i32, i32) {
    %c0_i32 = arith.constant 0 : i32
    %c0_i32_0 = arith.constant 0 : i32
    %c0_i32_1 = arith.constant 0 : i32
    return %c0_i32, %c0_i32_0 : i32, i32
  }
  func.func @transform_2(%arg0: i32) -> (i32, i32) {
    %c0_i32 = arith.constant 0 : i32
    %c0_i32_0 = arith.constant 0 : i32
    %c0_i32_1 = arith.constant 0 : i32
    return %c0_i32, %c0_i32_0 : i32, i32
  }
  func.func @transform_3(%arg0: i32) -> (i32, i32, i32) {
    %c0_i32 = arith.constant 0 : i32
    %c0_i32_0 = arith.constant 0 : i32
    %c0_i32_1 = arith.constant 0 : i32
    %c0_i32_2 = arith.constant 0 : i32
    return %c0_i32, %c0_i32_0, %c0_i32_1 : i32, i32, i32
  }
  func.func @transform_4(%arg0: i32) -> (i32, i32, i32) {
    %c0_i32 = arith.constant 0 : i32
    %c0_i32_0 = arith.constant 0 : i32
    %c0_i32_1 = arith.constant 0 : i32
    %c0_i32_2 = arith.constant 0 : i32
    return %c0_i32, %c0_i32_0, %c0_i32_1 : i32, i32, i32
  }
  func.func @transform_5(%arg0: i32) -> (i32, i32) {
    %c0_i32 = arith.constant 0 : i32
    %c0_i32_0 = arith.constant 0 : i32
    %c0_i32_1 = arith.constant 0 : i32
    return %c0_i32, %c0_i32_0 : i32, i32
  }
  func.func @transform_6(%arg0: i32) -> (i32, i32) {
    %c0_i32 = arith.constant 0 : i32
    %c0_i32_0 = arith.constant 0 : i32
    %c0_i32_1 = arith.constant 0 : i32
    return %c0_i32, %c0_i32_0 : i32, i32
  }
  func.func @transform_7(%arg0: i32) -> (i32, i32) {
    %c0_i32 = arith.constant 0 : i32
    %c0_i32_0 = arith.constant 0 : i32
    %c0_i32_1 = arith.constant 0 : i32
    return %c0_i32, %c0_i32_0 : i32, i32
  }
  func.func @transform_8(%arg0: i32) -> (i32, i32) {
    %c0_i32 = arith.constant 0 : i32
    %c0_i32_0 = arith.constant 0 : i32
    %c0_i32_1 = arith.constant 0 : i32
    return %c0_i32, %c0_i32_0 : i32, i32
  }
  func.func @transform_9(%arg0: i32) -> (i32, i32) {
    %c0_i32 = arith.constant 0 : i32
    %c0_i32_0 = arith.constant 0 : i32
    return %arg0, %c0_i32 : i32, i32
  }
}

</mosaic_0001>

<bundles_post_ra>
// kernel: tpu_custom_call.1
= control target key start
LH: loop header
LB: loop body
LE: loop exit
PB: predicated region body
PF: predicated region fallthrough
CT: control target
= control target key end

     0   :  { %s2938_s0 = inlined_call_operand.hbm [shape: bf16[256,128], index: 0, kind: input, shape index: {}]   ;;  %s2939_s1 = inlined_call_operand.hbm [shape: bf16[128,128], index: 1, kind: input, shape index: {}]   ;;  %s2940_s2 = inlined_call_operand.vmem [shape: f32[1,128], index: 2, kind: input, shape index: {}]   ;;  %s2941_s3 = inlined_call_operand.hbm [shape: bf16[2,128,128], index: 3, kind: input, shape index: {}]   ;;  %s2942_s4 = inlined_call_operand.vmem [shape: f32[2,1,128], index: 4, kind: input, shape index: {}]   ;;  %s2943_s5 = inlined_call_operand.hbm [shape: bf16[128,128], index: 5, kind: input, shape index: {}]   ;;  %s2944_s6 = inlined_call_operand.vmem [shape: f32[1,128], index: 6, kind: input, shape index: {}]   ;;  %s2945_s7 = inlined_call_operand.hbm [shape: bf16[128,128], index: 7, kind: input, shape index: {}]   ;;  %s2946_s8 = inlined_call_operand.vmem [shape: f32[1,128], index: 8, kind: input, shape index: {}]   ;;  %s2947_s9 = inlined_call_operand.hbm [shape: f32[256,128], index: 9, kind: output, shape index: {}]  }
   0x1   :  { %2954 = sst [smem:[#allocation16_spill]] %s2939_s1 }
   0x2   :  { %2955 = sst [smem:[#allocation17_spill]] %s2941_s3 }
   0x3   :  { %2956 = sst [smem:[#allocation18_spill]] %s2943_s5 }
   0x4   :  { %14 = vsyncpa [#allocation3], 0 }
   0x5   :  { %16 = vsyncpa [#allocation3 + $0x1], 0 }
   0x6   :  { %17 = vsyncpa [#allocation6], 0 }
   0x7   :  { %18 = vsyncpa [#allocation9], 0 }
   0x8   :  { %19 = vsyncpa [#allocation4], 0 }
   0x9   :  { %21 = vsyncpa [#allocation4 + $0x1], 0  ;;  %s2521_s30 = smov 0   ;;  %s2523_s10 = smov 0  }
   0xa   :  { %s2525_s11 = smov 0   ;;  %s2527_s12 = smov 0  }
   0xb LB: > { %s2542_s13 = sadd.s32 4294967295, %s2459_s12   ;;  %s1718_s14 = sadd.s32 4294967294, %s2459_s12   ;;  %s2459_s12 = sphi %s2527_s12, %s2980_s12   ;;  %s2455_s11 = sphi %s2525_s11, %s2979_s11   ;;  %s2451_s10 = sphi %s2523_s10, %s2978_s10   ;;  %s2447_s30 = sphi %s2521_s30, %s2977_s30  }
   0xc   : > { %p47_p0 = scmp.ne.s32.totalorder %s2451_s10, %s2447_s30  ;;  %p2948_p1 = scmp.eq.s32.totalorder %s2542_s13, 0 }
   0xd   : > { %p239_p2 = scmp.eq.s32.totalorder %s2542_s13, 1  ;;  %p245_p3 = scmp.eq.s32.totalorder %s1718_s14, 1 }
   0xe   : > { %p2551_p4 = por %p2948_p1, %p47_p0  ;;  %p1719_p5 = scmp.ge.s32.totalorder %s2459_s12, 1 }
   0xf   : > { %p2556_p6 = por %p245_p3, %p47_p0  ;;  %p252_p7 = scmp.lt.s32.totalorder %s2459_s12, 3 }
  0x10   : > { %s2957_s15 = scalar_select %p2551_p4, 1, 0 }
  0x11   : > { %s2958_s16 = scalar_select %p2556_p6, 1, 0 }
  0x12   : > { %p2561_p8 = pnand %p1719_p5, %p252_p7  ;;  %s2461_s18 = smov [#allocation5]  }
  0x13   : > { %s264_s19 = sshll.u32 %s2461_s18, 4  ;;  %s2462_s21 = smov [#allocation8]   ;;  %s265_s19 = int_to_ptr.vmem [resolvable:$true] %s264_s19 }
  0x14   : > { %s2959_s17 = scalar_select %p2561_p8, 1, 0 }
  0x15   : > { %p2072_p9 = pneg %p2561_p8  ;;  %s296_s22 = sshll.u32 %s2462_s21, 4  ;;  %s297_s22 = int_to_ptr.vmem [resolvable:$true] %s296_s22 }
  0x16   : > { %s2463_s23 = smov [#allocation7]   ;;  %s2266_s25 = scalar_lea.vmem %s265_s19, 1024 }
  0x17   : > { %p2570_p11 = pnand %p2072_p9, %p2948_p1  ;;  %s280_s24 = sshll.u32 %s2463_s23, 4  ;;  %s281_s24 = int_to_ptr.vmem [resolvable:$true] %s280_s24 }
  0x18   : > { %p2267_p13 = scmp.ne.s32.totalorder %s265_s19, %s2266_s25  ;;  %p2274_p5 = scmp.lt.s32.totalorder %s265_s19, %s265_s19 }
  0x19   : > { %p2257_p12 = pneg %p2570_p11  ;;  %p2275_p7 = scmp.lt.s32.totalorder %s2266_s25, %s2266_s25 }
  0x1b   : > { %p2269_p0 = pnand %p2267_p13, %p2257_p12  ;;  %p2276_p9 = por %p2275_p7, %p2274_p5 }
  0x1d   : > { %p2270_p3 = pneg %p2269_p0 }
  0x1f   : > { %p2277_p10 = pnand %p2276_p9, %p2270_p3 }
  0x21   : > { %2280 = shalt.err (!%p2277_p10)
}
  0x22   : > { %s2949_s26 = smov 64   ;;  %s2950_s27 = smov 4  }
  0x23   : > { %s2961_s1 = sld [smem:[#allocation16_spill]]  ;;  %s2292_s14 = scalar_lea.vmem %s297_s22, 1024 }
  0x24   : > { %p2293_p13 = scmp.ne.s32.totalorder %s297_s22, %s2292_s14  ;;  %p2300_p3 = scmp.lt.s32.totalorder %s297_s22, %s297_s22 }
  0x25   : > { %p2301_p10 = scmp.lt.s32.totalorder %s2292_s14, %s2292_s14 }
  0x26   : > { %p2295_p0 = pnand %p2293_p13, %p2257_p12 }
  0x27   : > { %p2302_p7 = por %p2301_p10, %p2300_p3 }
  0x28   : > { %p2296_p5 = pneg %p2295_p0 }
  0x29   : > { %2075 = dma.hbm_to_vmem [thread:$0]  (!%p2570_p11), %s2961_s1, 1024, %s265_s19, [#allocation6], %s2949_s26, %s2949_s26, %s2950_s27  }
  0x2a   : > { %p2303_p9 = pnand %p2302_p7, %p2296_p5 }
  0x2c   : > { %2306 = shalt.err (!%p2303_p9)
}
  0x2d   : > { %s2962_s5 = sld [smem:[#allocation18_spill]]  ;;  %s2318_s19 = scalar_lea.vmem %s281_s24, 2048 }
  0x2e   : > { %p2319_p1 = scmp.ne.s32.totalorder %s281_s24, %s2318_s19  ;;  %p2326_p3 = scmp.lt.s32.totalorder %s281_s24, %s281_s24 }
  0x2f   : > { %p2327_p5 = scmp.lt.s32.totalorder %s2318_s19, %s2318_s19 }
  0x30   : > { %p2321_p13 = pnand %p2319_p1, %p2257_p12 }
  0x31   : > { %p2328_p10 = por %p2327_p5, %p2326_p3 }
  0x32   : > { %p2322_p0 = pneg %p2321_p13 }
  0x33   : > { %2081 = dma.hbm_to_vmem [thread:$0]  (!%p2570_p11), %s2962_s5, 1024, %s297_s22, [#allocation9], %s2949_s26, %s2949_s26, %s2950_s27  }
  0x34   : > { %p2329_p7 = pnand %p2328_p10, %p2322_p0 }
  0x36   : > { %2332 = shalt.err (!%p2329_p7)
}
  0x37   : > { %s2963_s3 = sld [smem:[#allocation17_spill]]  ;;  %s2466_s22 = smov [#allocation10]  }
  0x38   : > { %s312_s28 = sshll.u32 %s2466_s22, 4  ;;  %s313_s28 = int_to_ptr.vmem [resolvable:$true] %s312_s28 }
  0x39   : > { %s2344_s29 = scalar_lea.vmem %s313_s28, 1024  ;;  %p2352_p0 = scmp.lt.s32.totalorder %s313_s28, %s313_s28 }
  0x3a   : > { %p2345_p1 = scmp.ne.s32.totalorder %s313_s28, %s2344_s29  ;;  %p2353_p3 = scmp.lt.s32.totalorder %s2344_s29, %s2344_s29 }
  0x3c   : > { %p2347_p9 = pnand %p2345_p1, %p2257_p12  ;;  %p2354_p5 = por %p2353_p3, %p2352_p0 }
  0x3d   : > { %2078 = dma.hbm_to_vmem [thread:$0]  (!%p2570_p11), %s2963_s3, 2048, %s281_s24, [#allocation6], %s2949_s26, %s2949_s26, %s2950_s27  }
  0x3e   : > { %p2348_p13 = pneg %p2347_p9 }
  0x40   : > { %p2355_p10 = pnand %p2354_p5, %p2348_p13 }
  0x42   : > { %2358 = shalt.err (!%p2355_p10)
}
  0x43   : > { %2084 = dma.hbm_to_vmem [thread:$0]  (!%p2570_p11), %s2945_s7, 1024, %s313_s28, [#allocation9], %s2949_s26, %s2949_s26, %s2950_s27  }
  0x44   : > { %s2621_s18 = sadd.s32 1, %s2459_s12   ;;  %s34_s20 = sadd.s32 1, %s2455_s11 }
  0x45   : > { %s31_s21 = ssub.s32 %s2459_s12, %s2621_s18  ;;  %p41_p12 = scmp.ne.s32.totalorder %s2455_s11, %s2451_s10 }
  0x46   : > { %p32_p7 = scmp.eq.s32.totalorder %s31_s21, 0  ;;  %p42_p1 = scmp.eq.s32.totalorder %s2459_s12, 0 }
  0x47   : > { %p2631_p9 = por %p239_p2, %p41_p12  ;;  %p2097_p13 = scmp.lt.s32.totalorder %s2459_s12, 2 }
  0x48   : > { %s2637_s23 = scalar_select %p32_p7, %s2455_s11, %s34_s20  }
  0x49   : > { %s2964_s19 = scalar_select %p2631_p9, 1, 0 }
  0x4a   : > { %p43_p0 = por %p42_p1, %p41_p12  ;;  %s329_s25 = sand.u32 1, %s2455_s11  }
  0x4b   : > { %s1725_s22 = sshll.u32 %s329_s25, 6  ;;  %s1794_s28 = sshll.u32 %s2459_s12, 10 }
  0x4c   : > { %s2644_s14 = scalar_lea.hbm %s2938_s0, %s1794_s28  ;;  %s333_s21 = scalar_lea.vmem [#allocation2], %s1725_s22 }
  0x4d   : > { %s340_s26 = sshll.u32 %s333_s21, 4  ;;  %p2648_p2 = pnand %p2097_p13, %p43_p0  ;;  %s2646_s26 = int_to_ptr.vmem [resolvable:$true] %s340_s26 }
  0x4e   : > { %s2652_s20 = scalar_lea.sflag [#allocation3], %s329_s25  ;;  %s2359_s1 = scalar_lea.hbm %s2644_s14, 1024 }
  0x4f   : > { %p2360_p11 = scmp.ne.s32.totalorder %s2644_s14, %s2359_s1  ;;  %p2361_p3 = pneg %p2648_p2 }
  0x50   : > { %s2364_s22 = scalar_lea.hbm %s2938_s0, 2048  ;;  %p2365_p12 = scmp.lt.s32.totalorder %s2644_s14, %s2938_s0 }
  0x51   : > { %p2362_p5 = pnand %p2361_p3, %p2360_p11  ;;  %p2366_p7 = scmp.lt.s32.totalorder %s2364_s22, %s2359_s1 }
  0x53   : > { %p2363_p10 = pneg %p2362_p5  ;;  %p2367_p1 = por %p2366_p7, %p2365_p12 }
  0x55   : > { %p2368_p13 = pnand %p2367_p1, %p2363_p10 }
  0x57   : > { %2371 = shalt.err (!%p2368_p13)
}
  0x58   : > { %s2372_s25 = scalar_lea.vmem %s2646_s26, 1024  ;;  %s2467_s3 = smov [#allocation2]  }
  0x59   : > { %p2373_p0 = scmp.ne.s32.totalorder %s2646_s26, %s2372_s25  ;;  %s2377_s5 = sshll.u32 %s2467_s3, 4  ;;  %s2378_s5 = int_to_ptr.vmem [resolvable:$false] %s2377_s5 }
  0x5a   : > { %s2379_s28 = scalar_lea.vmem %s2378_s5, 2048  ;;  %p2380_p5 = scmp.lt.s32.totalorder %s2646_s26, %s2378_s5 }
  0x5b   : > { %p2375_p6 = pnand %p2373_p0, %p2361_p3  ;;  %p2381_p9 = scmp.lt.s32.totalorder %s2379_s28, %s2372_s25 }
  0x5d   : > { %p2376_p11 = pneg %p2375_p6  ;;  %p2382_p4 = por %p2381_p9, %p2380_p5 }
  0x5f   : > { %p2383_p8 = pnand %p2382_p4, %p2376_p11 }
  0x61   : > { %2386 = shalt.err (!%p2383_p8)
}
  0x62   : > { %s2966_s1 = smov 4   ;;  %s2967_s29 = smov 64  }
  0x63   : > { %2088 = dma.hbm_to_vmem [thread:$0]  (!%p2648_p2), %s2644_s14, 1024, %s2646_s26, %s2652_s20, %s2967_s29, %s2967_s29, %s2966_s1  }
  0x64   : > { %p2968_p6 = scmp.ne.s32.totalorder %s2959_s17, 0 }
  0x65   : > { %s2679_s3 = sand.u32 (!%p2968_p6), 1, %s2451_s10   ;;  %p2969_p4 = scmp.ne.s32.totalorder (!%p2968_p6), %s2957_s15, 0 }
  0x66   : > { %352 = sbr.rel (%p2968_p6) target bundleno = 1525 (0x5f5), region = 56  ;;  %s1729_s5 = sshll.u32 (!%p2968_p6), %s2679_s3, 6 }
  0x67   : > { %s355_s22 = scalar_lea.sflag (!%p2968_p6), [#allocation3], %s2679_s3  ;;  %s2683_s24 = scalar_lea.vmem (!%p2968_p6), [#allocation2], %s1729_s5 }
  0x6b   : > { %2430 = dma.done.wait (%p2969_p4), %s355_s22, 1024  }
  0x6c   : > { %2432 = vsyncadd (%p2969_p4), %s355_s22, 4294966272  ;;  %p2970_p8 = scmp.eq.s32.totalorder %s2542_s13, 0 }
  0x6e   : > { %2434 = dma.done.wait (%p2970_p8), [#allocation6], 3072   ;;  %p2971_p9 = pmov %p2970_p8 }
  0x6f   : > { %p2972_p2 = pmov %p2970_p8 }
  0x70   : > { %2436 = vsyncadd (%p2971_p9), [#allocation6], 4294964224 }
  0x71   : > { %2438 = dma.done.wait (%p2972_p2), [#allocation9], 2048   ;;  %p2973_p3 = pmov %p2972_p2 }
  0x72   : > { %v2143_v0 = vld [vmem:[#allocation5 + $0x38] sm:$0xff]   ;;  %v2144_v1 = vld [vmem:[#allocation5 + $0x30] sm:$0xff]   ;;  %v2145_v2 = vld [vmem:[#allocation5 + $0x28] sm:$0xff]   ;;  %s1734_s29 = sshll.u32 %s2679_s3, 7  ;;  %s1795_s22 = sshll.u32 %s2542_s13, 11 }
  0x73   : > { %2440 = vsyncadd (%p2973_p3), [#allocation9], 4294965248  ;;  %1876 = vmatprep.subr.bf16.mxu0 %v2143_v0  ;;  %v2146_v3 = vld [vmem:[#allocation5 + $0x20] sm:$0xff]   ;;  %v2147_v5 = vld [vmem:[#allocation5 + $0x18] sm:$0xff]   ;;  %s2855_s5 = scalar_lea.vmem [#allocation11], %s1734_s29  ;;  %s2891_s26 = scalar_lea.hbm %s2947_s9, %s1795_s22 }
  0x74   : > { %1877 = vmatpush3.bf16.msra.mxu0 %v2143_v0  ;;  %v2151_v4 = vld [vmem:[%s2683_s24] sm:$0xff]   ;;  %v2148_v6 = vld [vmem:[#allocation5 + $0x10] sm:$0xff]   ;;  %v2159_v7 = vld [vmem:[#allocation7 + $0x38] sm:$0xff]   ;;  %s1594_s13 = scalar_lea.sflag [#allocation4], %s2679_s3  ;;  %p2974_p12 = scmp.ne.s32.totalorder %s2964_s19, 0 }
  0x75   : > { %1878 = vmatprep.subr.bf16.mxu0 %v2144_v1  ;;  %1892 = vmatprep.mubr.bf16.mxu0 %v2151_v4  ;;  %v2160_v8 = vld [vmem:[#allocation7 + $0x30] sm:$0xff]   ;;  %v2149_v9 = vld [vmem:[#allocation5 + $0x8] sm:$0xff]   ;;  %v2150_v11 = vld [vmem:[#allocation5] sm:$0xff]   ;;  %s2468_s14 = smov [#allocation11]  }
  0x76   : > { %1908 = vmatprep.subr.bf16.mxu1 %v2159_v7  ;;  %v2161_v10 = vld [vmem:[#allocation7 + $0x28] sm:$0xff]   ;;  %v2162_v12 = vld [vmem:[#allocation7 + $0x20] sm:$0xff]   ;;  %v2163_v13 = vld [vmem:[#allocation7 + $0x18] sm:$0xff]   ;;  %s2391_s20 = sshll.u32 %s2468_s14, 4  ;;  %s2392_s20 = int_to_ptr.vmem [resolvable:$false] %s2391_s20 }
  0x77   : > { %1909 = vmatpush3.bf16.msra.mxu1 %v2159_v7  ;;  %v2152_v14 = vld [vmem:[%s2683_s24 + $0x8] sm:$0xff]   ;;  %v2153_v15 = vld [vmem:[%s2683_s24 + $0x10] sm:$0xff]   ;;  %v2154_v16 = vld [vmem:[%s2683_s24 + $0x18] sm:$0xff]   ;;  %s2393_s21 = scalar_lea.vmem %s2392_s20, 4096 }
  0x78   : > { %1879 = vmatpush3.bf16.msra.mxu0 %v2144_v1  ;;  %1910 = vmatprep.subr.bf16.mxu1 %v2160_v8  ;;  %v2155_v17 = vld [vmem:[%s2683_s24 + $0x20] sm:$0xff]   ;;  %v2156_v18 = vld [vmem:[%s2683_s24 + $0x28] sm:$0xff]   ;;  %v2157_v19 = vld [vmem:[%s2683_s24 + $0x30] sm:$0xff]  }
  0x79   : > { %1880 = vmatprep.subr.bf16.mxu0 %v2145_v2  ;;  %v2158_v20 = vld [vmem:[%s2683_s24 + $0x38] sm:$0xff]   ;;  %v2164_v21 = vld [vmem:[#allocation7 + $0x10] sm:$0xff]   ;;  %v2165_v22 = vld [vmem:[#allocation7 + $0x8] sm:$0xff]   ;;  %s1607_s24 = sshll.u32 %s2855_s5, 4  ;;  %s2893_s24 = int_to_ptr.vmem [resolvable:$true] %s1607_s24 }
  0x7a   : > { %v2166_v23 = vld [vmem:[#allocation7] sm:$0xff]   ;;  %v2167_v24 = vld [vmem:[#allocation7 + $0x78] sm:$0xff]   ;;  %v2168_v25 = vld [vmem:[#allocation7 + $0x70] sm:$0xff]   ;;  %s2387_s27 = scalar_lea.vmem %s2893_s24, 2048  ;;  %p2394_p13 = scmp.lt.s32.totalorder %s2893_s24, %s2392_s20 }
  0x7b   : > { %1911 = vmatpush3.bf16.msra.mxu1 %v2160_v8  ;;  %v2169_v26 = vld [vmem:[#allocation7 + $0x68] sm:$0xff]   ;;  %v2170_v27 = vld [vmem:[#allocation7 + $0x60] sm:$0xff]   ;;  %v2171_v28 = vld [vmem:[#allocation7 + $0x58] sm:$0xff]   ;;  %p2388_p10 = scmp.ne.s32.totalorder %s2893_s24, %s2387_s27  ;;  %p2395_p0 = scmp.lt.s32.totalorder %s2393_s21, %s2387_s27 }
  0x7c   : > { %1881 = vmatpush3.bf16.msra.mxu0 %v2145_v2  ;;  %1912 = vmatprep.subr.bf16.mxu1 %v2161_v10  ;;  %v1735_v31 = vld [vmem:[%s2940_s2] ss:$0 sm:$0xff] }
  0x7d   : > { %1882 = vmatprep.subr.bf16.mxu0 %v2146_v3  ;;  %p2389_p7 = pnand %p2388_p10, %p2974_p12  ;;  %p2396_p11 = por %p2395_p0, %p2394_p13 }
  0x7f   : > { %1913 = vmatpush3.bf16.msra.mxu1 %v2161_v10  ;;  %p2390_p1 = pneg %p2389_p7 }
  0x80   : > { %1883 = vmatpush3.bf16.msra.mxu0 %v2146_v3  ;;  %1914 = vmatprep.subr.bf16.mxu1 %v2162_v12 }
  0x81   : > { %1884 = vmatprep.subr.bf16.mxu0 %v2147_v5  ;;  %p2397_p5 = pnand %p2396_p11, %p2390_p1 }
  0x83   : > { %1915 = vmatpush3.bf16.msra.mxu1 %v2162_v12 }
  0x84   : > { %1885 = vmatpush3.bf16.msra.mxu0 %v2147_v5  ;;  %1916 = vmatprep.subr.bf16.mxu1 %v2163_v13 }
  0x85   : > { %1886 = vmatprep.subr.bf16.mxu0 %v2148_v6 }
  0x87   : > { %1917 = vmatpush3.bf16.msra.mxu1 %v2163_v13 }
  0x88   : > { %1887 = vmatpush3.bf16.msra.mxu0 %v2148_v6  ;;  %1918 = vmatprep.subr.bf16.mxu1 %v2164_v21 }
  0x89   : > { %1888 = vmatprep.subr.bf16.mxu0 %v2149_v9 }
  0x8b   : > { %1919 = vmatpush3.bf16.msra.mxu1 %v2164_v21 }
  0x8c   : > { %1889 = vmatpush3.bf16.msra.mxu0 %v2149_v9  ;;  %1920 = vmatprep.subr.bf16.mxu1 %v2165_v22 }
  0x8d   : > { %1890 = vmatprep.subr.bf16.mxu0 %v2150_v11 }
  0x8f   : > { %1921 = vmatpush3.bf16.msra.mxu1 %v2165_v22  ;;  %v2172_v22 = vld [vmem:[#allocation7 + $0x50] sm:$0xff]  }
  0x90   : > { %1891 = vmatpush3.bf16.msra.mxu0 %v2150_v11  ;;  %1922 = vmatprep.subr.bf16.mxu1 %v2166_v23 }
  0x91   : > { %1940 = vmatprep.subr.bf16.mxu0 %v2167_v24 }
  0x93   : > { %1893 = vmatmul.mubr.bf16.vlgmr.msra.gmra.mxu0 %v2152_v14  ;;  %1923 = vmatpush3.bf16.msra.mxu1 %v2166_v23  ;;  %v2173_v23 = vld [vmem:[#allocation7 + $0x48] sm:$0xff]  }
  0x94   : > { %1896 = vmatprep.mubr.bf16.mxu0 %v2153_v15  ;;  %1941 = vmatpush3.bf16.msra.mxu0 %v2167_v24  ;;  %v2174_v24 = vld [vmem:[#allocation7 + $0x40] sm:$0xff]  }
  0x95   : > { %1942 = vmatprep.subr.bf16.mxu0 %v2168_v25 }
  0x98   : > { %1943 = vmatpush3.bf16.msra.mxu0 %v2168_v25  ;;  %v2175_v25 = vld [vmem:[#allocation8 + $0x38] sm:$0xff]  }
  0x99   : > { %1944 = vmatprep.subr.bf16.mxu0 %v2169_v26  ;;  %1972 = vmatprep.subr.bf16.mxu1 %v2175_v25 }
  0x9b   : > { %1897 = vmatmul.mubr.bf16.gmra.mxu0 %v2154_v16 }
  0x9c   : > { %1900 = vmatprep.mubr.bf16.mxu0 %v2155_v17  ;;  %1945 = vmatpush3.bf16.msra.mxu0 %v2169_v26  ;;  %v2176_v26 = vld [vmem:[#allocation8 + $0x30] sm:$0xff]  }
  0x9d   : > { %1946 = vmatprep.subr.bf16.mxu0 %v2170_v27 }
  0xa0   : > { %1947 = vmatpush3.bf16.msra.mxu0 %v2170_v27  ;;  %v2177_v27 = vld [vmem:[#allocation8 + $0x28] sm:$0xff]  }
  0xa1   : > { %1948 = vmatprep.subr.bf16.mxu0 %v2171_v28 }
  0xa3   : > { %1901 = vmatmul.mubr.bf16.gmra.mxu0 %v2156_v18 }
  0xa4   : > { %1904 = vmatprep.mubr.bf16.mxu0 %v2157_v19  ;;  %1949 = vmatpush3.bf16.msra.mxu0 %v2171_v28  ;;  %v2178_v28 = vld [vmem:[#allocation8 + $0x20] sm:$0xff]  }
  0xa5   : > { %1950 = vmatprep.subr.bf16.mxu0 %v2172_v22 }
  0xa8   : > { %1951 = vmatpush3.bf16.msra.mxu0 %v2172_v22 }
  0xa9   : > { %1952 = vmatprep.subr.bf16.mxu0 %v2173_v23 }
  0xab   : > { %1905 = vmatmul.mubr.bf16.gmra.mxu0 %v2158_v20 }
  0xac   : > { %1953 = vmatpush3.bf16.msra.mxu0 %v2173_v23  ;;  %v2180_v23 = vld [vmem:[#allocation8 + $0x10] sm:$0xff]  }
  0xad   : > { %1954 = vmatprep.subr.bf16.mxu0 %v2174_v24 }
  0xb0   : > { %1955 = vmatpush3.bf16.msra.mxu0 %v2174_v24  ;;  %v2181_v24 = vld [vmem:[#allocation8 + $0x8] sm:$0xff]  }
 0x153   : > { %v1894_v29 = vpop.f32.mrf.mxu0 }
 0x154   : > { %v590_v35 = vadd.f32 %v1894_v29, %v1735_v31  ;;  %v2179_v29 = vld [vmem:[#allocation8 + $0x18] sm:$0xff]  }
 0x155   : > { %v581_v30 = vpop.f32.mrf.mxu0 }
 0x156   : > { %v582_v33 = vadd.f32 %v1735_v31, %v581_v30  ;;  %v646_v42 = vmax.f32 %v590_v35, 0.0 }
 0x157   : > { %v1895_v32 = vpop.f32.mrf.mxu0 }
 0x158   : > { %v593_v34 = vadd.f32 %v1895_v32, %v1735_v31  ;;  %v644_v40 = vmax.f32 %v582_v33, 0.0  ;;  %v1752_v32 = vld [vmem:[%s2942_s4] ss:$0 sm:$0xff] }
 0x159   : > { %v584_v36 = vpop.f32.mrf.mxu0 }
 0x15a   : > { %v585_v37 = vadd.f32 %v1735_v31, %v584_v36  ;;  %v647_v38 = vmax.f32 %v593_v34, 0.0 }
 0x15b   : > { %v1898_v39 = vpop.f32.mrf.mxu0 }
 0x15c   : > { %v645_v41 = vmax.f32 %v585_v37, 0.0  ;;  %v661_v45 = vpack.c.bf16 %v647_v38, %v646_v42  ;;  %v606_v49 = vadd.f32 %v1898_v39, %v1735_v31 }
 0x15d   : > { %v597_v43 = vpop.f32.mrf.mxu0 }
 0x15e   : > { %v660_v44 = vpack.c.bf16 %v645_v41, %v644_v40  ;;  %v598_v47 = vadd.f32 %v1735_v31, %v597_v43  ;;  %v650_v56 = vmax.f32 %v606_v49, 0.0 }
 0x15f   : > { %v1899_v46 = vpop.f32.mrf.mxu0 }
 0x160   : > { %v609_v48 = vadd.f32 %v1899_v46, %v1735_v31  ;;  %1924 = vmatprep.mubr.bf16.mxu1 %v660_v44  ;;  %v648_v54 = vmax.f32 %v598_v47, 0.0 }
 0x161   : > { %v600_v50 = vpop.f32.mrf.mxu0  ;;  %1925 = vmatmul.mubr.bf16.vlgmr.msra.gmra.mxu1 %v661_v45 }
 0x162   : > { %v601_v51 = vadd.f32 %v1735_v31, %v600_v50  ;;  %v651_v52 = vmax.f32 %v609_v48, 0.0  ;;  %1973 = vmatpush3.bf16.msra.mxu1 %v2175_v25  ;;  %v2182_v25 = vld [vmem:[#allocation8] sm:$0xff]  }
 0x163   : > { %v1902_v53 = vpop.f32.mrf.mxu0  ;;  %1974 = vmatprep.subr.bf16.mxu1 %v2176_v26 }
 0x164   : > { %v649_v55 = vmax.f32 %v601_v51, 0.0  ;;  %v663_v59 = vpack.c.bf16 %v651_v52, %v650_v56  ;;  %v622_v63 = vadd.f32 %v1902_v53, %v1735_v31 }
 0x165   : > { %v613_v57 = vpop.f32.mrf.mxu0 }
 0x166   : > { %v662_v58 = vpack.c.bf16 %v649_v55, %v648_v54  ;;  %v614_v61 = vadd.f32 %v1735_v31, %v613_v57  ;;  %v654_v6 = vmax.f32 %v622_v63, 0.0  ;;  %1975 = vmatpush3.bf16.msra.mxu1 %v2176_v26  ;;  %v2183_v26 = vld [vmem:[#allocation10 + $0x38] sm:$0xff]  }
 0x167   : > { %v1903_v60 = vpop.f32.mrf.mxu0  ;;  %1976 = vmatprep.subr.bf16.mxu1 %v2177_v27  ;;  %2004 = vmatprep.subr.bf16.mxu0 %v2183_v26 }
 0x168   : > { %v625_v62 = vadd.f32 %v1903_v60, %v1735_v31  ;;  %1928 = vmatprep.mubr.bf16.mxu1 %v662_v58  ;;  %v652_v4 = vmax.f32 %v614_v61, 0.0 }
 0x169   : > { %v616_v0 = vpop.f32.mrf.mxu0  ;;  %1929 = vmatmul.mubr.bf16.gmra.mxu1 %v663_v59 }
 0x16a   : > { %v617_v1 = vadd.f32 %v1735_v31, %v616_v0  ;;  %v655_v2 = vmax.f32 %v625_v62, 0.0  ;;  %1977 = vmatpush3.bf16.msra.mxu1 %v2177_v27  ;;  %v2184_v27 = vld [vmem:[#allocation10 + $0x30] sm:$0xff]  }
 0x16b   : > { %v1906_v3 = vpop.f32.mrf.mxu0  ;;  %1978 = vmatprep.subr.bf16.mxu1 %v2178_v28 }
 0x16c   : > { %v653_v5 = vmax.f32 %v617_v1, 0.0  ;;  %v665_v9 = vpack.c.bf16 %v655_v2, %v654_v6  ;;  %v638_v13 = vadd.f32 %v1906_v3, %v1735_v31 }
 0x16d   : > { %v629_v7 = vpop.f32.mrf.mxu0 }
 0x16e   : > { %v664_v8 = vpack.c.bf16 %v653_v5, %v652_v4  ;;  %v630_v11 = vadd.f32 %v1735_v31, %v629_v7  ;;  %v658_v19 = vmax.f32 %v638_v13, 0.0  ;;  %1979 = vmatpush3.bf16.msra.mxu1 %v2178_v28  ;;  %v2185_v28 = vld [vmem:[#allocation10 + $0x28] sm:$0xff]  }
 0x16f   : > { %v1907_v10 = vpop.f32.mrf.mxu0  ;;  %1980 = vmatprep.subr.bf16.mxu1 %v2179_v29 }
 0x170   : > { %v641_v12 = vadd.f32 %v1907_v10, %v1735_v31  ;;  %1932 = vmatprep.mubr.bf16.mxu1 %v664_v8  ;;  %v656_v17 = vmax.f32 %v630_v11, 0.0 }
 0x171   : > { %v632_v14 = vpop.f32.mrf.mxu0  ;;  %1933 = vmatmul.mubr.bf16.gmra.mxu1 %v665_v9 }
 0x172   : > { %v633_v15 = vadd.f32 %v1735_v31, %v632_v14  ;;  %v659_v16 = vmax.f32 %v641_v12, 0.0  ;;  %1981 = vmatpush3.bf16.msra.mxu1 %v2179_v29  ;;  %v2186_v29 = vld [vmem:[#allocation10 + $0x20] sm:$0xff]  }
 0x173   : > { %1982 = vmatprep.subr.bf16.mxu1 %v2180_v23 }
 0x174   : > { %v657_v18 = vmax.f32 %v633_v15, 0.0  ;;  %v667_v21 = vpack.c.bf16 %v659_v16, %v658_v19 }
 0x176   : > { %v666_v20 = vpack.c.bf16 %v657_v18, %v656_v17  ;;  %1983 = vmatpush3.bf16.msra.mxu1 %v2180_v23 }
 0x177   : > { %1984 = vmatprep.subr.bf16.mxu1 %v2181_v24 }
 0x178   : > { %1936 = vmatprep.mubr.bf16.mxu1 %v666_v20 }
 0x179   : > { %1937 = vmatmul.mubr.bf16.gmra.mxu1 %v667_v21 }
 0x17a   : > { %1985 = vmatpush3.bf16.msra.mxu1 %v2181_v24  ;;  %v2188_v24 = vld [vmem:[#allocation10 + $0x10] sm:$0xff]  }
 0x17b   : > { %1986 = vmatprep.subr.bf16.mxu1 %v2182_v25 }
 0x17e   : > { %1987 = vmatpush3.bf16.msra.mxu1 %v2182_v25  ;;  %v2189_v25 = vld [vmem:[#allocation10 + $0x8] sm:$0xff]  }
 0x17f   : > { %2036 = vmatprep.subr.bf16.mxu1 %v2183_v26 }
 0x221   : > { %v1926_v30 = vpop.f32.mrf.mxu1 }
 0x222   : > { %v782_v36 = vadd.f32 %v1926_v30, %v1752_v32  ;;  %v2711_v30 = vld [vmem:[#allocation10 + $0x18] sm:$0xff]  }
 0x223   : > { %v773_v31 = vpop.f32.mrf.mxu1 }
 0x224   : > { %v774_v34 = vadd.f32 %v1752_v32, %v773_v31  ;;  %v838_v43 = vmax.f32 %v782_v36, 0.0 }
 0x225   : > { %v1927_v33 = vpop.f32.mrf.mxu1 }
 0x226   : > { %v785_v35 = vadd.f32 %v1927_v33, %v1752_v32  ;;  %v836_v41 = vmax.f32 %v774_v34, 0.0  ;;  %v1762_v33 = vld [vmem:[%s2942_s4 + $0x1] ss:$0 sm:$0xff] }
 0x227   : > { %v776_v37 = vpop.f32.mrf.mxu1 }
 0x228   : > { %v777_v38 = vadd.f32 %v1752_v32, %v776_v37  ;;  %v839_v39 = vmax.f32 %v785_v35, 0.0 }
 0x229   : > { %v1930_v40 = vpop.f32.mrf.mxu1 }
 0x22a   : > { %v837_v42 = vmax.f32 %v777_v38, 0.0  ;;  %v853_v46 = vpack.c.bf16 %v839_v39, %v838_v43  ;;  %v798_v50 = vadd.f32 %v1930_v40, %v1752_v32 }
 0x22b   : > { %v789_v44 = vpop.f32.mrf.mxu1 }
 0x22c   : > { %v852_v45 = vpack.c.bf16 %v837_v42, %v836_v41  ;;  %v790_v48 = vadd.f32 %v1752_v32, %v789_v44  ;;  %v842_v57 = vmax.f32 %v798_v50, 0.0 }
 0x22d   : > { %v1931_v47 = vpop.f32.mrf.mxu1 }
 0x22e   : > { %v801_v49 = vadd.f32 %v1931_v47, %v1752_v32  ;;  %1956 = vmatprep.mubr.bf16.mxu0 %v852_v45  ;;  %v840_v55 = vmax.f32 %v790_v48, 0.0 }
 0x22f   : > { %v792_v51 = vpop.f32.mrf.mxu1  ;;  %1957 = vmatmul.mubr.bf16.vlgmr.msra.gmra.mxu0 %v853_v46 }
 0x230   : > { %v793_v52 = vadd.f32 %v1752_v32, %v792_v51  ;;  %v843_v53 = vmax.f32 %v801_v49, 0.0  ;;  %2005 = vmatpush3.bf16.msra.mxu0 %v2183_v26 }
 0x231   : > { %v1934_v54 = vpop.f32.mrf.mxu1  ;;  %2006 = vmatprep.subr.bf16.mxu0 %v2184_v27 }
 0x232   : > { %v841_v56 = vmax.f32 %v793_v52, 0.0  ;;  %v855_v60 = vpack.c.bf16 %v843_v53, %v842_v57  ;;  %v814_v0 = vadd.f32 %v1934_v54, %v1752_v32 }
 0x233   : > { %v805_v58 = vpop.f32.mrf.mxu1 }
 0x234   : > { %v854_v59 = vpack.c.bf16 %v841_v56, %v840_v55  ;;  %v806_v62 = vadd.f32 %v1752_v32, %v805_v58  ;;  %v846_v7 = vmax.f32 %v814_v0, 0.0  ;;  %2007 = vmatpush3.bf16.msra.mxu0 %v2184_v27 }
 0x235   : > { %v1935_v61 = vpop.f32.mrf.mxu1  ;;  %2008 = vmatprep.subr.bf16.mxu0 %v2185_v28 }
 0x236   : > { %v817_v63 = vadd.f32 %v1935_v61, %v1752_v32  ;;  %1960 = vmatprep.mubr.bf16.mxu0 %v854_v59  ;;  %v844_v5 = vmax.f32 %v806_v62, 0.0 }
 0x237   : > { %v808_v1 = vpop.f32.mrf.mxu1  ;;  %1961 = vmatmul.mubr.bf16.gmra.mxu0 %v855_v60 }
 0x238   : > { %v809_v2 = vadd.f32 %v1752_v32, %v808_v1  ;;  %v847_v3 = vmax.f32 %v817_v63, 0.0  ;;  %2009 = vmatpush3.bf16.msra.mxu0 %v2185_v28 }
 0x239   : > { %v1938_v4 = vpop.f32.mrf.mxu1  ;;  %2010 = vmatprep.subr.bf16.mxu0 %v2186_v29 }
 0x23a   : > { %v845_v6 = vmax.f32 %v809_v2, 0.0  ;;  %v857_v10 = vpack.c.bf16 %v847_v3, %v846_v7  ;;  %v830_v14 = vadd.f32 %v1938_v4, %v1752_v32 }
 0x23b   : > { %v821_v8 = vpop.f32.mrf.mxu1 }
 0x23c   : > { %v856_v9 = vpack.c.bf16 %v845_v6, %v844_v5  ;;  %v822_v12 = vadd.f32 %v1752_v32, %v821_v8  ;;  %v850_v20 = vmax.f32 %v830_v14, 0.0  ;;  %2011 = vmatpush3.bf16.msra.mxu0 %v2186_v29 }
 0x23d   : > { %v1939_v11 = vpop.f32.mrf.mxu1  ;;  %2012 = vmatprep.subr.bf16.mxu0 %v2711_v30 }
 0x23e   : > { %v833_v13 = vadd.f32 %v1939_v11, %v1752_v32  ;;  %1964 = vmatprep.mubr.bf16.mxu0 %v856_v9  ;;  %v848_v18 = vmax.f32 %v822_v12, 0.0 }
 0x23f   : > { %v824_v15 = vpop.f32.mrf.mxu1  ;;  %1965 = vmatmul.mubr.bf16.gmra.mxu0 %v857_v10 }
 0x240   : > { %v825_v16 = vadd.f32 %v1752_v32, %v824_v15  ;;  %v851_v17 = vmax.f32 %v833_v13, 0.0  ;;  %2013 = vmatpush3.bf16.msra.mxu0 %v2711_v30 }
 0x241   : > { %2014 = vmatprep.subr.bf16.mxu0 %v2188_v24 }
 0x242   : > { %v849_v19 = vmax.f32 %v825_v16, 0.0  ;;  %v859_v22 = vpack.c.bf16 %v851_v17, %v850_v20 }
 0x244   : > { %v858_v21 = vpack.c.bf16 %v849_v19, %v848_v18  ;;  %2015 = vmatpush3.bf16.msra.mxu0 %v2188_v24 }
 0x245   : > { %2016 = vmatprep.subr.bf16.mxu0 %v2189_v25 }
 0x246   : > { %1968 = vmatprep.mubr.bf16.mxu0 %v858_v21 }
 0x247   : > { %1969 = vmatmul.mubr.bf16.gmra.mxu0 %v859_v22 }
 0x248   : > { %2017 = vmatpush3.bf16.msra.mxu0 %v2189_v25 }
 0x2ef   : > { %v1958_v31 = vpop.f32.mrf.mxu0 }
 0x2f0   : > { %v976_v37 = vadd.f32 %v1958_v31, %v1762_v33 }
 0x2f1   : > { %v967_v32 = vpop.f32.mrf.mxu0 }
 0x2f2   : > { %v968_v35 = vadd.f32 %v1762_v33, %v967_v32  ;;  %v1032_v44 = vmax.f32 %v976_v37, 0.0 }
 0x2f3   : > { %v1959_v34 = vpop.f32.mrf.mxu0 }
 0x2f4   : > { %v979_v36 = vadd.f32 %v1959_v34, %v1762_v33  ;;  %v1030_v42 = vmax.f32 %v968_v35, 0.0 }
 0x2f5   : > { %v970_v38 = vpop.f32.mrf.mxu0 }
 0x2f6   : > { %v971_v39 = vadd.f32 %v1762_v33, %v970_v38  ;;  %v1033_v40 = vmax.f32 %v979_v36, 0.0 }
 0x2f7   : > { %v1962_v41 = vpop.f32.mrf.mxu0 }
 0x2f8   : > { %v1031_v43 = vmax.f32 %v971_v39, 0.0  ;;  %v1047_v47 = vpack.c.bf16 %v1033_v40, %v1032_v44  ;;  %v992_v51 = vadd.f32 %v1962_v41, %v1762_v33 }
 0x2f9   : > { %v983_v45 = vpop.f32.mrf.mxu0 }
 0x2fa   : > { %v1046_v46 = vpack.c.bf16 %v1031_v43, %v1030_v42  ;;  %v984_v49 = vadd.f32 %v1762_v33, %v983_v45  ;;  %v1036_v58 = vmax.f32 %v992_v51, 0.0 }
 0x2fb   : > { %v1963_v48 = vpop.f32.mrf.mxu0 }
 0x2fc   : > { %v995_v50 = vadd.f32 %v1963_v48, %v1762_v33  ;;  %1988 = vmatprep.mubr.bf16.mxu1 %v1046_v46  ;;  %v1034_v56 = vmax.f32 %v984_v49, 0.0 }
 0x2fd   : > { %v986_v52 = vpop.f32.mrf.mxu0  ;;  %1989 = vmatmul.mubr.bf16.vlgmr.msra.gmra.mxu1 %v1047_v47 }
 0x2fe   : > { %v987_v53 = vadd.f32 %v1762_v33, %v986_v52  ;;  %2044 = vmatpush3.bf16.msra.mxu1 %v2183_v26  ;;  %v1037_v54 = vmax.f32 %v995_v50, 0.0  ;;  %v2190_v26 = vld [vmem:[#allocation10] sm:$0xff]  }
 0x2ff   : > { %v1966_v55 = vpop.f32.mrf.mxu0  ;;  %2037 = vmatprep.subr.bf16.mxu1 %v2184_v27  ;;  %2018 = vmatprep.subr.bf16.mxu0 %v2190_v26 }
 0x300   : > { %v1035_v57 = vmax.f32 %v987_v53, 0.0  ;;  %v1049_v61 = vpack.c.bf16 %v1037_v54, %v1036_v58  ;;  %v1008_v1 = vadd.f32 %v1966_v55, %v1762_v33  ;;  %2019 = vmatpush3.bf16.msra.mxu0 %v2190_v26 }
 0x301   : > { %v999_v59 = vpop.f32.mrf.mxu0 }
 0x302   : > { %v1048_v60 = vpack.c.bf16 %v1035_v57, %v1034_v56  ;;  %2045 = vmatpush3.bf16.msra.mxu1 %v2184_v27  ;;  %v1000_v63 = vadd.f32 %v1762_v33, %v999_v59  ;;  %v1040_v8 = vmax.f32 %v1008_v1, 0.0 }
 0x303   : > { %v1967_v62 = vpop.f32.mrf.mxu0  ;;  %2038 = vmatprep.subr.bf16.mxu1 %v2185_v28 }
 0x304   : > { %v1011_v0 = vadd.f32 %v1967_v62, %v1762_v33  ;;  %1992 = vmatprep.mubr.bf16.mxu1 %v1048_v60  ;;  %v1038_v6 = vmax.f32 %v1000_v63, 0.0 }
 0x305   : > { %v1002_v2 = vpop.f32.mrf.mxu0  ;;  %1993 = vmatmul.mubr.bf16.gmra.mxu1 %v1049_v61 }
 0x306   : > { %v1003_v3 = vadd.f32 %v1762_v33, %v1002_v2  ;;  %2046 = vmatpush3.bf16.msra.mxu1 %v2185_v28  ;;  %v1041_v4 = vmax.f32 %v1011_v0, 0.0 }
 0x307   : > { %v1970_v5 = vpop.f32.mrf.mxu0  ;;  %2039 = vmatprep.subr.bf16.mxu1 %v2186_v29 }
 0x308   : > { %v1039_v7 = vmax.f32 %v1003_v3, 0.0  ;;  %v1051_v11 = vpack.c.bf16 %v1041_v4, %v1040_v8  ;;  %v1024_v15 = vadd.f32 %v1970_v5, %v1762_v33 }
 0x309   : > { %v1015_v9 = vpop.f32.mrf.mxu0 }
 0x30a   : > { %v1050_v10 = vpack.c.bf16 %v1039_v7, %v1038_v6  ;;  %2047 = vmatpush3.bf16.msra.mxu1 %v2186_v29  ;;  %v1016_v13 = vadd.f32 %v1762_v33, %v1015_v9  ;;  %v1044_v21 = vmax.f32 %v1024_v15, 0.0  ;;  %v1771_v29 = vld [vmem:[%s2944_s6] ss:$0 sm:$0xff] }
 0x30b   : > { %v1971_v12 = vpop.f32.mrf.mxu0  ;;  %2040 = vmatprep.subr.bf16.mxu1 %v2711_v30 }
 0x30c   : > { %v1027_v14 = vadd.f32 %v1971_v12, %v1762_v33  ;;  %1996 = vmatprep.mubr.bf16.mxu1 %v1050_v10  ;;  %v1042_v19 = vmax.f32 %v1016_v13, 0.0 }
 0x30d   : > { %v1018_v16 = vpop.f32.mrf.mxu0  ;;  %1997 = vmatmul.mubr.bf16.gmra.mxu1 %v1051_v11 }
 0x30e   : > { %v1019_v17 = vadd.f32 %v1762_v33, %v1018_v16  ;;  %2048 = vmatpush3.bf16.msra.mxu1 %v2711_v30  ;;  %v1045_v18 = vmax.f32 %v1027_v14, 0.0 }
 0x30f   : > { %2041 = vmatprep.subr.bf16.mxu1 %v2188_v24 }
 0x310   : > { %v1043_v20 = vmax.f32 %v1019_v17, 0.0  ;;  %v1053_v23 = vpack.c.bf16 %v1045_v18, %v1044_v21 }
 0x312   : > { %v1052_v22 = vpack.c.bf16 %v1043_v20, %v1042_v19  ;;  %2049 = vmatpush3.bf16.msra.mxu1 %v2188_v24  ;;  %v1414_v20 = vlaneseq }
 0x313   : > { %2042 = vmatprep.subr.bf16.mxu1 %v2189_v25 }
 0x314   : > { %2000 = vmatprep.mubr.bf16.mxu1 %v1052_v22  ;;  %v2723_v21 = vand.u32 127, %v1414_v20  ;;  %v1780_v22 = vld [vmem:[%s2946_s8] ss:$0 sm:$0xff] }
 0x315   : > { %2001 = vmatmul.mubr.bf16.gmra.mxu1 %v1053_v23 }
 0x316   : > { %2050 = vmatpush3.bf16.msra.mxu1 %v2189_v25  ;;  %vm1416_vm0 = vcmp.lt.s32.totalorder %v2723_v21, 4 }
 0x317   : > { %2043 = vmatprep.subr.bf16.mxu1 %v2190_v26 }
 0x31a   : > { %2051 = vmatpush3.bf16.msra.mxu1 %v2190_v26 }
 0x3bd   : > { %v1990_v27 = vpop.f32.mrf.mxu1 }
 0x3be   : > { %v1168_v33 = vadd.f32 %v1990_v27, %v1771_v29 }
 0x3bf   : > { %v1159_v28 = vpop.f32.mrf.mxu1 }
 0x3c0   : > { %v1160_v31 = vadd.f32 %v1771_v29, %v1159_v28  ;;  %v1224_v40 = vmax.f32 %v1168_v33, 0.0 }
 0x3c1   : > { %v1991_v30 = vpop.f32.mrf.mxu1 }
 0x3c2   : > { %v1171_v32 = vadd.f32 %v1991_v30, %v1771_v29  ;;  %v1222_v38 = vmax.f32 %v1160_v31, 0.0 }
 0x3c3   : > { %v1162_v34 = vpop.f32.mrf.mxu1 }
 0x3c4   : > { %v1163_v35 = vadd.f32 %v1771_v29, %v1162_v34  ;;  %v1225_v36 = vmax.f32 %v1171_v32, 0.0 }
 0x3c5   : > { %v1994_v37 = vpop.f32.mrf.mxu1 }
 0x3c6   : > { %v1223_v39 = vmax.f32 %v1163_v35, 0.0  ;;  %v1239_v43 = vpack.c.bf16 %v1225_v36, %v1224_v40  ;;  %v1184_v47 = vadd.f32 %v1994_v37, %v1771_v29 }
 0x3c7   : > { %v1175_v41 = vpop.f32.mrf.mxu1 }
 0x3c8   : > { %v1238_v42 = vpack.c.bf16 %v1223_v39, %v1222_v38  ;;  %v1176_v45 = vadd.f32 %v1771_v29, %v1175_v41  ;;  %v1228_v54 = vmax.f32 %v1184_v47, 0.0 }
 0x3c9   : > { %v1995_v44 = vpop.f32.mrf.mxu1 }
 0x3ca   : > { %v1187_v46 = vadd.f32 %v1995_v44, %v1771_v29  ;;  %2020 = vmatprep.mubr.bf16.mxu0 %v1238_v42  ;;  %v1226_v52 = vmax.f32 %v1176_v45, 0.0 }
 0x3cb   : > { %v1178_v48 = vpop.f32.mrf.mxu1  ;;  %2021 = vmatmul.mubr.bf16.vlgmr.msra.gmra.mxu0 %v1239_v43 }
 0x3cc   : > { %v1179_v49 = vadd.f32 %v1771_v29, %v1178_v48  ;;  %v1229_v50 = vmax.f32 %v1187_v46, 0.0 }
 0x3cd   : > { %v1998_v51 = vpop.f32.mrf.mxu1 }
 0x3ce   : > { %v1227_v53 = vmax.f32 %v1179_v49, 0.0  ;;  %v1241_v57 = vpack.c.bf16 %v1229_v50, %v1228_v54  ;;  %v1200_v61 = vadd.f32 %v1998_v51, %v1771_v29 }
 0x3cf   : > { %v1191_v55 = vpop.f32.mrf.mxu1 }
 0x3d0   : > { %v1240_v56 = vpack.c.bf16 %v1227_v53, %v1226_v52  ;;  %v1192_v59 = vadd.f32 %v1771_v29, %v1191_v55  ;;  %v1232_v4 = vmax.f32 %v1200_v61, 0.0 }
 0x3d1   : > { %v1999_v58 = vpop.f32.mrf.mxu1 }
 0x3d2   : > { %v1203_v60 = vadd.f32 %v1999_v58, %v1771_v29  ;;  %2024 = vmatprep.mubr.bf16.mxu0 %v1240_v56  ;;  %v1230_v2 = vmax.f32 %v1192_v59, 0.0 }
 0x3d3   : > { %v1194_v62 = vpop.f32.mrf.mxu1  ;;  %2025 = vmatmul.mubr.bf16.gmra.mxu0 %v1241_v57 }
 0x3d4   : > { %v1195_v63 = vadd.f32 %v1771_v29, %v1194_v62  ;;  %v1233_v0 = vmax.f32 %v1203_v60, 0.0 }
 0x3d5   : > { %v2002_v1 = vpop.f32.mrf.mxu1 }
 0x3d6   : > { %v1231_v3 = vmax.f32 %v1195_v63, 0.0  ;;  %v1243_v7 = vpack.c.bf16 %v1233_v0, %v1232_v4  ;;  %v1216_v11 = vadd.f32 %v2002_v1, %v1771_v29 }
 0x3d7   : > { %v1207_v5 = vpop.f32.mrf.mxu1 }
 0x3d8   : > { %v1242_v6 = vpack.c.bf16 %v1231_v3, %v1230_v2  ;;  %v1208_v9 = vadd.f32 %v1771_v29, %v1207_v5  ;;  %v1236_v17 = vmax.f32 %v1216_v11, 0.0 }
 0x3d9   : > { %v2003_v8 = vpop.f32.mrf.mxu1 }
 0x3da   : > { %v1219_v10 = vadd.f32 %v2003_v8, %v1771_v29  ;;  %2028 = vmatprep.mubr.bf16.mxu1 %v1242_v6  ;;  %v1234_v15 = vmax.f32 %v1208_v9, 0.0 }
 0x3db   : > { %v1210_v12 = vpop.f32.mrf.mxu1  ;;  %2029 = vmatmul.mubr.bf16.vlgmr.msra.gmra.mxu1 %v1243_v7 }
 0x3dc   : > { %v1211_v13 = vadd.f32 %v1771_v29, %v1210_v12  ;;  %v1237_v14 = vmax.f32 %v1219_v10, 0.0 }
 0x3de   : > { %v1235_v16 = vmax.f32 %v1211_v13, 0.0  ;;  %v1245_v19 = vpack.c.bf16 %v1237_v14, %v1236_v17 }
 0x3e0   : > { %v1244_v18 = vpack.c.bf16 %v1235_v16, %v1234_v15 }
 0x3e2   : > { %2032 = vmatprep.mubr.bf16.mxu1 %v1244_v18 }
 0x3e3   : > { %2033 = vmatmul.mubr.bf16.gmra.mxu1 %v1245_v19 }
 0x48b   : > { %v2022_v23 = vpop.f32.mrf.mxu0 }
 0x48c   : > { %v1360_v24 = vadd.f32 %v2022_v23, %v1780_v22 }
 0x48d   : > { %v1351_v25 = vpop.f32.mrf.mxu0 }
 0x48e   : > { %v1352_v26 = vadd.f32 %v1780_v22, %v1351_v25  ;;  %v2731_v27 = vsel %vm1416_vm0, %v1360_v24, -1e+30 }
 0x48f   : > { %1437 = vmax.xlane.f32.xlu1 %v2731_v27  ;;  %v2023_v28 = vpop.f32.mrf.mxu0 }
 0x490   : > { %v1363_v29 = vadd.f32 %v2023_v28, %v1780_v22  ;;  %v2736_v30 = vsel %vm1416_vm0, %v1352_v26, -1e+30 }
 0x491   : > { %v1354_v31 = vpop.f32.mrf.mxu0  ;;  %1433 = vmax.xlane.f32.xlu0 %v2736_v30 }
 0x492   : > { %v1355_v32 = vadd.f32 %v1780_v22, %v1354_v31  ;;  %v1420_v33 = vsel %vm1416_vm0, %v1363_v29, -1e+30 }
 0x493   : > { %1439 = vmax.xlane.f32.xlu1 %v1420_v33  ;;  %v2026_v34 = vpop.f32.mrf.mxu0 }
 0x494   : > { %v1376_v35 = vadd.f32 %v2026_v34, %v1780_v22  ;;  %v1418_v36 = vsel %vm1416_vm0, %v1355_v32, -1e+30 }
 0x495   : > { %v1367_v37 = vpop.f32.mrf.mxu0  ;;  %1435 = vmax.xlane.f32.xlu0 %v1418_v36 }
 0x496   : > { %v1368_v39 = vadd.f32 %v1780_v22, %v1367_v37  ;;  %v1423_v41 = vsel %vm1416_vm0, %v1376_v35, -1e+30 }
 0x497   : > { %v2027_v38 = vpop.f32.mrf.mxu0 }
 0x498   : > { %v1379_v40 = vadd.f32 %v2027_v38, %v1780_v22  ;;  %v1421_v47 = vsel %vm1416_vm0, %v1368_v39, -1e+30 }
 0x499   : > { %v1370_v42 = vpop.f32.mrf.mxu0  ;;  %1445 = vmax.xlane.f32.xlu0 %v1423_v41 }
 0x49a   : > { %v1371_v43 = vadd.f32 %v1780_v22, %v1370_v42  ;;  %v1424_v44 = vsel %vm1416_vm0, %v1379_v40, -1e+30 }
 0x49b   : > { %v2030_v45 = vpop.f32.mrf.mxu1  ;;  %1447 = vmax.xlane.f32.xlu1 %v1424_v44 }
 0x49c   : > { %v1392_v46 = vadd.f32 %v2030_v45, %v1780_v22  ;;  %v2751_v49 = vsel %vm1416_vm0, %v1371_v43, -1e+30 }
 0x49d   : > { %v1383_v48 = vpop.f32.mrf.mxu1  ;;  %1441 = vmax.xlane.f32.xlu0 %v1421_v47 }
 0x49e   : > { %v1384_v51 = vadd.f32 %v1780_v22, %v1383_v48  ;;  %v2756_v53 = vsel %vm1416_vm0, %v1392_v46, -1e+30 }
 0x49f   : > { %v2031_v50 = vpop.f32.mrf.mxu1  ;;  %1443 = vmax.xlane.f32.xlu1 %v2751_v49 }
 0x4a0   : > { %v1395_v52 = vadd.f32 %v2031_v50, %v1780_v22  ;;  %v2766_v58 = vsel %vm1416_vm0, %v1384_v51, -1e+30 }
 0x4a1   : > { %v1386_v54 = vpop.f32.mrf.mxu1  ;;  %1453 = vmax.xlane.f32.xlu0 %v2756_v53 }
 0x4a2   : > { %v1387_v55 = vadd.f32 %v1780_v22, %v1386_v54  ;;  %v2761_v56 = vsel %vm1416_vm0, %v1395_v52, -1e+30 }
 0x4a3   : > { %v2034_v57 = vpop.f32.mrf.mxu1  ;;  %1455 = vmax.xlane.f32.xlu1 %v2761_v56 }
 0x4a4   : > { %v2771_v61 = vsel %vm1416_vm0, %v1387_v55, -1e+30  ;;  %v1408_v63 = vadd.f32 %v2034_v57, %v1780_v22 }
 0x4a5   : > { %v1399_v59 = vpop.f32.mrf.mxu1  ;;  %1449 = vmax.xlane.f32.xlu0 %v2766_v58 }
 0x4a6   : > { %v1400_v60 = vadd.f32 %v1780_v22, %v1399_v59  ;;  %v2785_v5 = vsel %vm1416_vm0, %v1408_v63, -1e+30 }
 0x4a7   : > { %v2035_v62 = vpop.f32.mrf.mxu1  ;;  %1451 = vmax.xlane.f32.xlu1 %v2771_v61 }
 0x4a8   : > { %v2776_v0 = vsel %vm1416_vm0, %v1400_v60, -1e+30  ;;  %v1411_v3 = vadd.f32 %v2035_v62, %v1780_v22 }
 0x4a9   : > { %v1402_v1 = vpop.f32.mrf.mxu1  ;;  %1457 = vmax.xlane.f32.xlu0 %v2776_v0 }
 0x4aa   : > { %v1403_v2 = vadd.f32 %v1780_v22, %v1402_v1  ;;  %v2791_v6 = vsel %vm1416_vm0, %v1411_v3, -1e+30 }
 0x4ac   : > { %v2781_v4 = vsel %vm1416_vm0, %v1403_v2, -1e+30 }
 0x4ad   : > { %1459 = vmax.xlane.f32.xlu1 %v2781_v4  ;;  %1461 = vmax.xlane.f32.xlu0 %v2785_v5 }
 0x4b1   : > { %1463 = vmax.xlane.f32.xlu1 %v2791_v6 }
 0x518   : > { %v1438_v7 = vpop.xlane.xlu1 %1437 }
 0x519   : > { %v1467_v8 = vsub.f32 %v2731_v27, %v1438_v7 }
 0x51a   : > { %v1434_v9 = vpop.xlane.xlu0 %1433 }
 0x51b   : > { %v1485_v10 = vmul.f32 1.442695, %v1467_v8  ;;  %v1465_v11 = vsub.f32 %v2736_v30, %v1434_v9 }
 0x51c   : > { %v1440_v12 = vpop.xlane.xlu1 %1439 }
 0x51d   : > { %2191 = vpow2.f32 %v1485_v10  ;;  %v1481_v13 = vmul.f32 1.442695, %v1465_v11  ;;  %v1468_v14 = vsub.f32 %v1420_v33, %v1440_v12 }
 0x51e   : > { %v1436_v15 = vpop.xlane.xlu0 %1435 }
 0x51f   : > { %v1487_v16 = vmul.f32 1.442695, %v1468_v14  ;;  %v1466_v17 = vsub.f32 %v1418_v36, %v1436_v15  ;;  %2193 = vpow2.f32 %v1481_v13 }
 0x521   : > { %2195 = vpow2.f32 %v1487_v16  ;;  %v1483_v18 = vmul.f32 1.442695, %v1466_v17 }
 0x522   : > { %v1446_v19 = vpop.xlane.xlu0 %1445 }
 0x523   : > { %v1471_v20 = vsub.f32 %v1423_v41, %v1446_v19  ;;  %2197 = vpow2.f32 %v1483_v18 }
 0x524   : > { %v1448_v21 = vpop.xlane.xlu1 %1447 }
 0x525   : > { %v1493_v22 = vmul.f32 1.442695, %v1471_v20  ;;  %v1472_v23 = vsub.f32 %v1424_v44, %v1448_v21 }
 0x526   : > { %v1442_v24 = vpop.xlane.xlu0 %1441 }
 0x527   : > { %2199 = vpow2.f32 %v1493_v22  ;;  %v1495_v25 = vmul.f32 1.442695, %v1472_v23  ;;  %v1469_v26 = vsub.f32 %v1421_v47, %v1442_v24 }
 0x528   : > { %v1444_v27 = vpop.xlane.xlu1 %1443 }
 0x529   : > { %2201 = vpow2.f32 %v1495_v25  ;;  %v1489_v28 = vmul.f32 1.442695, %v1469_v26  ;;  %v1470_v29 = vsub.f32 %v2751_v49, %v1444_v27 }
 0x52a   : > { %v2797_v30 = vpop.eup %2191  ;;  %v1454_v31 = vpop.xlane.xlu0 %1453 }
 0x52b   : > { %2203 = vpow2.f32 %v1489_v28  ;;  %v1491_v32 = vmul.f32 1.442695, %v1470_v29  ;;  %v1475_v33 = vsub.f32 %v2756_v53, %v1454_v31  ;;  %1517 = vadd.xlane.f32.xlu0 %v2797_v30 }
 0x52c   : > { %v1456_v34 = vpop.xlane.xlu1 %1455  ;;  %v2801_v35 = vpop.eup %2193 }
 0x52d   : > { %2205 = vpow2.f32 %v1491_v32  ;;  %v1501_v36 = vmul.f32 1.442695, %v1475_v33  ;;  %v1476_v37 = vsub.f32 %v2761_v56, %v1456_v34 }
 0x52e   : > { %v2804_v38 = vpop.eup %2195  ;;  %v1450_v39 = vpop.xlane.xlu0 %1449 }
 0x52f   : > { %2207 = vpow2.f32 %v1501_v36  ;;  %v1503_v40 = vmul.f32 1.442695, %v1476_v37  ;;  %v1473_v41 = vsub.f32 %v2766_v58, %v1450_v39  ;;  %1519 = vadd.xlane.f32.xlu1 %v2804_v38  ;;  %1513 = vadd.xlane.f32.xlu0 %v2801_v35 }
 0x530   : > { %v1452_v42 = vpop.xlane.xlu1 %1451  ;;  %v2810_v45 = vpop.eup %2197 }
 0x531   : > { %2209 = vpow2.f32 %v1503_v40  ;;  %v1497_v43 = vmul.f32 1.442695, %v1473_v41  ;;  %v1474_v44 = vsub.f32 %v2771_v61, %v1452_v42 }
 0x532   : > { %v1458_v46 = vpop.xlane.xlu0 %1457 }
 0x533   : > { %2211 = vpow2.f32 %v1497_v43  ;;  %v1499_v47 = vmul.f32 1.442695, %v1474_v44  ;;  %v1477_v48 = vsub.f32 %v2776_v0, %v1458_v46  ;;  %1515 = vadd.xlane.f32.xlu1 %v2810_v45 }
 0x534   : > { %v2814_v49 = vpop.eup %2199 }
 0x535   : > { %2213 = vpow2.f32 %v1499_v47  ;;  %v1505_v50 = vmul.f32 1.442695, %v1477_v48  ;;  %1525 = vadd.xlane.f32.xlu0 %v2814_v49 }
 0x536   : > { %v2817_v51 = vpop.eup %2201  ;;  %v1460_v52 = vpop.xlane.xlu1 %1459 }
 0x537   : > { %v1462_v53 = vpop.xlane.xlu0 %1461  ;;  %2215 = vpow2.f32 %v1505_v50  ;;  %v1478_v54 = vsub.f32 %v2781_v4, %v1460_v52  ;;  %1527 = vadd.xlane.f32.xlu1 %v2817_v51 }
 0x538   : > { %v1479_v55 = vsub.f32 %v2785_v5, %v1462_v53  ;;  %v2822_v56 = vpop.eup %2203 }
 0x539   : > { %v1507_v57 = vmul.f32 1.442695, %v1478_v54  ;;  %1521 = vadd.xlane.f32.xlu0 %v2822_v56 }
 0x53a   : > { %v1509_v58 = vmul.f32 1.442695, %v1479_v55  ;;  %v2825_v59 = vpop.eup %2205  ;;  %v1464_v60 = vpop.xlane.xlu1 %1463 }
 0x53b   : > { %2217 = vpow2.f32 %v1507_v57  ;;  %v1480_v61 = vsub.f32 %v2791_v6, %v1464_v60  ;;  %1523 = vadd.xlane.f32.xlu1 %v2825_v59 }
 0x53c   : > { %v2829_v62 = vpop.eup %2207  ;;  %2219 = vpow2.f32 %v1509_v58 }
 0x53d   : > { %v1511_v63 = vmul.f32 1.442695, %v1480_v61  ;;  %1533 = vadd.xlane.f32.xlu0 %v2829_v62 }
 0x53e   : > { %v2832_v0 = vpop.eup %2209 }
 0x53f   : > { %2221 = vpow2.f32 %v1511_v63  ;;  %1535 = vadd.xlane.f32.xlu1 %v2832_v0 }
 0x540   : > { %v2835_v1 = vpop.eup %2211 }
 0x541   : > { %1529 = vadd.xlane.f32.xlu0 %v2835_v1 }
 0x542   : > { %v2838_v2 = vpop.eup %2213 }
 0x543   : > { %1531 = vadd.xlane.f32.xlu1 %v2838_v2 }
 0x544   : > { %v2841_v3 = vpop.eup %2215 }
 0x545   : > { %1537 = vadd.xlane.f32.xlu0 %v2841_v3 }
 0x548   : > { %v2844_v4 = vpop.eup %2217 }
 0x549   : > { %v2846_v5 = vpop.eup %2219  ;;  %1539 = vadd.xlane.f32.xlu1 %v2844_v4 }
 0x54a   : > { %1541 = vadd.xlane.f32.xlu0 %v2846_v5 }
 0x54c   : > { %v2850_v6 = vpop.eup %2221 }
 0x54d   : > { %1543 = vadd.xlane.f32.xlu1 %v2850_v6 }
 0x5b4   : > { %v1518_v7 = vpop.xlane.xlu0 %1517 }
 0x5b5   : > { %2223 = vrcp.f32 %v1518_v7 }
 0x5b8   : > { %v1520_v8 = vpop.xlane.xlu1 %1519  ;;  %v1514_v9 = vpop.xlane.xlu0 %1513 }
 0x5b9   : > { %2225 = vrcp.f32 %v1520_v8 }
 0x5ba   : > { %2227 = vrcp.f32 %v1514_v9 }
 0x5bc   : > { %v1516_v10 = vpop.xlane.xlu1 %1515 }
 0x5bd   : > { %2229 = vrcp.f32 %v1516_v10 }
 0x5be   : > { %v1526_v11 = vpop.xlane.xlu0 %1525 }
 0x5bf   : > { %2231 = vrcp.f32 %v1526_v11 }
 0x5c0   : > { %v1528_v12 = vpop.xlane.xlu1 %1527 }
 0x5c1   : > { %2233 = vrcp.f32 %v1528_v12 }
 0x5c2   : > { %v2224_v13 = vpop.eup %2223  ;;  %v1522_v14 = vpop.xlane.xlu0 %1521 }
 0x5c3   : > { %v1550_v15 = vmul.f32 %v2224_v13, %v2797_v30  ;;  %2235 = vrcp.f32 %v1522_v14 }
 0x5c4   : > { %v1524_v16 = vpop.xlane.xlu1 %1523 }
 0x5c5   : > { %1579 = vst [vmem:[%s2855_s5 + $0x10] sm:$0xff] %v1550_v15  ;;  %2237 = vrcp.f32 %v1524_v16 }
 0x5c6   : > { %v2226_v17 = vpop.eup %2225  ;;  %v1534_v18 = vpop.xlane.xlu0 %1533 }
 0x5c7   : > { %v2228_v19 = vpop.eup %2227  ;;  %v1552_v20 = vmul.f32 %v2226_v17, %v2804_v38  ;;  %2239 = vrcp.f32 %v1534_v18 }
 0x5c8   : > { %v1546_v21 = vmul.f32 %v2228_v19, %v2801_v35  ;;  %v1536_v22 = vpop.xlane.xlu1 %1535 }
 0x5c9   : > { %1580 = vst [vmem:[%s2855_s5 + $0x18] sm:$0xff] %v1552_v20  ;;  %2241 = vrcp.f32 %v1536_v22 }
 0x5ca   : > { %v2230_v23 = vpop.eup %2229  ;;  %1577 = vst [vmem:[%s2855_s5] sm:$0xff] %v1546_v21  ;;  %v1530_v24 = vpop.xlane.xlu0 %1529 }
 0x5cb   : > { %v1548_v25 = vmul.f32 %v2230_v23, %v2810_v45  ;;  %2243 = vrcp.f32 %v1530_v24 }
 0x5cc   : > { %v2232_v26 = vpop.eup %2231  ;;  %v1532_v27 = vpop.xlane.xlu1 %1531 }
 0x5cd   : > { %1578 = vst [vmem:[%s2855_s5 + $0x8] sm:$0xff] %v1548_v25  ;;  %v1558_v28 = vmul.f32 %v2232_v26, %v2814_v49  ;;  %2245 = vrcp.f32 %v1532_v27 }
 0x5ce   : > { %v2234_v29 = vpop.eup %2233  ;;  %v1538_v30 = vpop.xlane.xlu0 %1537 }
 0x5cf   : > { %1583 = vst [vmem:[%s2855_s5 + $0x30] sm:$0xff] %v1558_v28  ;;  %v1560_v31 = vmul.f32 %v2234_v29, %v2817_v51  ;;  %2247 = vrcp.f32 %v1538_v30 }
 0x5d0   : > { %v2236_v32 = vpop.eup %2235 }
 0x5d1   : > { %1584 = vst [vmem:[%s2855_s5 + $0x38] sm:$0xff] %v1560_v31  ;;  %v1554_v33 = vmul.f32 %v2236_v32, %v2822_v56 }
 0x5d2   : > { %v2238_v34 = vpop.eup %2237  ;;  %v1540_v35 = vpop.xlane.xlu1 %1539 }
 0x5d3   : > { %1581 = vst [vmem:[%s2855_s5 + $0x20] sm:$0xff] %v1554_v33  ;;  %v1556_v36 = vmul.f32 %v2238_v34, %v2825_v59  ;;  %2249 = vrcp.f32 %v1540_v35  ;;  %v1542_v37 = vpop.xlane.xlu0 %1541 }
 0x5d4   : > { %v2240_v38 = vpop.eup %2239  ;;  %2251 = vrcp.f32 %v1542_v37 }
 0x5d5   : > { %1582 = vst [vmem:[%s2855_s5 + $0x28] sm:$0xff] %v1556_v36  ;;  %v1566_v39 = vmul.f32 %v2240_v38, %v2829_v62 }
 0x5d6   : > { %v2242_v40 = vpop.eup %2241  ;;  %v1544_v41 = vpop.xlane.xlu1 %1543 }
 0x5d7   : > { %1587 = vst [vmem:[%s2855_s5 + $0x50] sm:$0xff] %v1566_v39  ;;  %v1568_v42 = vmul.f32 %v2242_v40, %v2832_v0  ;;  %2253 = vrcp.f32 %v1544_v41 }
 0x5d8   : > { %v2244_v43 = vpop.eup %2243 }
 0x5d9   : > { %1588 = vst [vmem:[%s2855_s5 + $0x58] sm:$0xff] %v1568_v42  ;;  %v1562_v44 = vmul.f32 %v2244_v43, %v2835_v1 }
 0x5da   : > { %v2246_v45 = vpop.eup %2245 }
 0x5db   : > { %1585 = vst [vmem:[%s2855_s5 + $0x40] sm:$0xff] %v1562_v44  ;;  %v1564_v46 = vmul.f32 %v2246_v45, %v2838_v2 }
 0x5dc   : > { %v2248_v47 = vpop.eup %2247 }
 0x5dd   : > { %1586 = vst [vmem:[%s2855_s5 + $0x48] sm:$0xff] %v1564_v46  ;;  %v1570_v48 = vmul.f32 %v2248_v47, %v2841_v3 }
 0x5df   : > { %1589 = vst [vmem:[%s2855_s5 + $0x60] sm:$0xff] %v1570_v48 }
 0x5e0   : > { %v2250_v49 = vpop.eup %2249 }
 0x5e1   : > { %v2252_v50 = vpop.eup %2251  ;;  %v1572_v51 = vmul.f32 %v2250_v49, %v2844_v4 }
 0x5e2   : > { %v1574_v52 = vmul.f32 %v2252_v50, %v2846_v5 }
 0x5e3   : > { %1590 = vst [vmem:[%s2855_s5 + $0x68] sm:$0xff] %v1572_v51 }
 0x5e4   : > { %v2254_v53 = vpop.eup %2253  ;;  %1591 = vst [vmem:[%s2855_s5 + $0x70] sm:$0xff] %v1574_v52 }
 0x5e5   : > { %v1576_v54 = vmul.f32 %v2254_v53, %v2850_v6 }
 0x5e7   : > { %1592 = vst [vmem:[%s2855_s5 + $0x78] sm:$0xff] %v1576_v54 }
 0x5e8   : > { %2400 = shalt.err (!%p2397_p5)
}
 0x5e9   : > { %s2401_s25 = scalar_lea.hbm %s2891_s26, 2048  ;;  %s2405_s29 = scalar_lea.hbm %s2947_s9, 4096 }
 0x5ea   : > { %p2402_p6 = scmp.ne.s32.totalorder %s2891_s26, %s2401_s25  ;;  %p2406_p9 = scmp.lt.s32.totalorder %s2891_s26, %s2947_s9 }
 0x5eb   : > { %p2407_p2 = scmp.lt.s32.totalorder %s2405_s29, %s2401_s25 }
 0x5ec   : > { %p2403_p4 = pnand %p2402_p6, %p2974_p12 }
 0x5ed   : > { %p2408_p3 = por %p2407_p2, %p2406_p9 }
 0x5ee   : > { %p2404_p8 = pneg %p2403_p4 }
 0x5f0   : > { %p2409_p10 = pnand %p2408_p3, %p2404_p8 }
 0x5f2   : > { %2412 = shalt.err (!%p2409_p10)
}
 0x5f3   : > { %s2469_s15 = smov 128   ;;  %s2470_s17 = smov 8  }
 0x5f4   : > { %2070 = dma.vmem_to_hbm [thread:$0]  (%p2974_p12), %s2893_s24, 2048, %s2891_s26, %s1594_s13, %s2469_s15, %s2469_s15, %s2470_s17  }
 0x5f5 PF: > { %s1622_s27 = sand.u32 1, %s2447_s30   ;;  %p2975_p7 = scmp.ne.s32.totalorder %s2958_s16, 0 }
 0x5f6   : > { %p2976_p1 = scmp.ge.s32.totalorder %s2459_s12, 2  ;;  %s1623_s14 = scalar_lea.sflag [#allocation4], %s1622_s27 }
 0x5f8   : > { %p2090_p13 = pnand %p2976_p1, %p2975_p7 }
 0x5fa   : > { %p2091_p0 = pneg %p2090_p13 }
 0x5fc   : > { %2442 = dma.done.wait (%p2091_p0), %s1623_s14, 2048  }
 0x5fd   : > { %2444 = vsyncadd (%p2091_p0), %s1623_s14, 4294965248  ;;  %p24_p11 = scmp.ge.s32.totalorder %s2621_s18, 4   ;;  %s2977_s30 = smov %s2451_s10 }
 0x5fe   : > { %s2978_s10 = smov %s2455_s11  ;;  %s2979_s11 = smov %s2637_s23 }
 0x5ff   : > { %s2980_s12 = smov %s2621_s18  ;;  %26 = sbr.rel (!%p24_p11) target bundleno = 11 (0xb), region = 119 }
 0x604   :  { %1628 = vsyncpa [#allocation3], 1 }
 0x605   :  { %1630 = vsyncpa [#allocation3 + $0x1], 1 }
 0x606   :  { %1631 = vsyncpa [#allocation6], 1 }
 0x607   :  { %1632 = vsyncpa [#allocation9], 1 }
 0x608   :  { %1633 = vsyncpa [#allocation4], 1 }
 0x609   :  { %1635 = vsyncpa [#allocation4 + $0x1], 1 }

</bundles_post_ra>
